<compile_context>
chip_gen: v6e
topology: v6e:2x2x1
jax: 0.10.0
libtpu: 0.0.40
codegen_flags: <defaults>
</compile_context>

<pallas_src>
import functools
import math

import jax
import jax.numpy as jnp
from jax.experimental import pallas as pl
from jax.experimental.pallas import tpu as pltpu


# ---------------------------------------------------------------------------
# In-kernel math helpers
# ---------------------------------------------------------------------------

def _gelu_tanh(x):
    # TODO(synk): HF BERT's default activation is exact erf-GELU; the tanh
    # approximation is used because tanh lowers cleanly to the TPU EUP.
    c = math.sqrt(2.0 / math.pi)
    return 0.5 * x * (1.0 + jnp.tanh(c * (x + 0.044715 * x * x * x)))


def _layernorm(x, gamma, beta, eps):
    mean = jnp.mean(x, axis=-1, keepdims=True)
    xc = x - mean
    var = jnp.mean(xc * xc, axis=-1, keepdims=True)
    return xc * jax.lax.rsqrt(var + eps) * gamma + beta


def _mm(a, b):
    # MXU matmul: bf16 operands, f32 accumulation.  Weights `b` are already
    # bf16 (pre-cast once in prepare_params); only the activation is cast here.
    return jnp.dot(a.astype(jnp.bfloat16), b, preferred_element_type=jnp.float32)


# ---------------------------------------------------------------------------
# Pallas kernels
# ---------------------------------------------------------------------------

def _dense_kernel(x_ref, w_ref, b_ref, o_ref, *, activation):
    # o = act(x @ w + b)
    y = _mm(x_ref[...], w_ref[...]) + b_ref[...]
    if activation == "gelu":
        y = _gelu_tanh(y)
    o_ref[...] = y.astype(o_ref.dtype)


def _ln_kernel(x_ref, g_ref, b_ref, o_ref, *, eps):
    x = x_ref[...].astype(jnp.float32)
    o_ref[...] = _layernorm(x, g_ref[...], b_ref[...], eps).astype(o_ref.dtype)


def _ffn_kernel(x_ref, w1_ref, b1_ref, w2_ref, b2_ref, g_ref, be_ref, o_ref, *, eps):
    # o = LayerNorm(gelu(x@w1+b1)@w2 + b2 + x); the (tm, intermediate)
    # activation never leaves VMEM and is held in bf16 for the second matmul.
    x = x_ref[...].astype(jnp.float32)
    h1 = _gelu_tanh(_mm(x, w1_ref[...]) + b1_ref[...]).astype(jnp.bfloat16)
    y = _mm(h1, w2_ref[...]) + b2_ref[...]
    o_ref[...] = _layernorm(y + x, g_ref[...], be_ref[...], eps).astype(o_ref.dtype)


def _attn_block_kernel(qkv_ref, res_ref, wo_ref, bo_ref, g_ref, be_ref, o_ref,
                       *, num_heads, scale, eps):
    # One batch element per grid step; all heads batched through one einsum.
    #   qkv_ref: (1, 3*nh, S, dh) bf16      res_ref: (1, S, H) f32
    #   wo_ref:  (nh, dh, H) bf16 resident
    #   o = LayerNorm(concat_heads(softmax(q k^T) v) @ wo + bo + res)
    qkv = qkv_ref[0]                                        # (3*nh, S, dh) bf16
    qh = qkv[:num_heads] * scale                            # scale folded into q
    kh = qkv[num_heads:2 * num_heads]
    vh = qkv[2 * num_heads:]
    s = jnp.einsum("hqd,hkd->hqk", qh, kh,
                   preferred_element_type=jnp.float32)      # (nh, S, S), no k.T
    s = s - jnp.max(s, axis=-1, keepdims=True)
    p = jnp.exp(s)
    p = p * pl.reciprocal(jnp.sum(p, axis=-1, keepdims=True), approx=True)
    ctx = jnp.einsum("hqk,hkd->hqd", p.astype(vh.dtype), vh,
                     preferred_element_type=jnp.float32)    # (nh, S, dh) f32
    # Fused output projection: concat_h(ctx) @ wo == sum_h ctx[h] @ wo[h].
    y = res_ref[0].astype(jnp.float32) + bo_ref[...]
    for h in range(num_heads):
        y = y + jnp.dot(ctx[h].astype(jnp.bfloat16), wo_ref[h],
                        preferred_element_type=jnp.float32)
    o_ref[0] = _layernorm(y, g_ref[...], be_ref[...], eps).astype(o_ref.dtype)


# ---------------------------------------------------------------------------
# pallas_call wrappers
# ---------------------------------------------------------------------------

def _const_spec(shape):
    """Spec for a weight/bias resident across the whole grid: constant
    index_map and single-buffered (double-buffering an unchanging block only
    wastes VMEM; at BERT-base this halves the FFN weight footprint)."""
    index_map = lambda i, _n=len(shape): (0,) * _n
    buffered = getattr(pl, "Buffered", None)
    if buffered is not None:
        try:
            return pl.BlockSpec(shape, index_map,
                                pipeline_mode=buffered(buffer_count=1))
        except (TypeError, ValueError):   # pipeline_mode unsupported -> fallback
            pass
    return pl.BlockSpec(shape, index_map)


def _nbytes(shape, dtype):
    return math.prod(shape) * jnp.dtype(dtype).itemsize


def _vmem_limit(pipelined_bytes, const_bytes):
    # Explicit VMEM budget: 2x for double-buffered pipelined blocks, resident
    # consts once, 3x headroom for in-kernel f32 intermediates; clamped below
    # v7x's 64 MiB physical VMEM (v5e/v6e scoped defaults are only 16/32 MiB).
    need = 3 * (2 * pipelined_bytes + const_bytes) + (8 << 20)
    return int(max(16 << 20, min(need, 60 << 20)))


def _row_tiling(m):
    """Largest aligned row tile; pad irregular M instead of falling back to a
    single whole-array block, and prefer >= 2 grid steps (v7x: 2 TensorCores)."""
    for t in (512, 256, 128):
        if m % t == 0:
            tm = t
            break
    else:
        tm = 128 if m > 128 else -(-m // 8) * 8
    mp = -(-m // tm) * tm
    if mp // tm == 1 and tm >= 16 and (tm // 2) % 8 == 0:
        tm //= 2
    return tm, mp


def _row_tiled_call(kernel, tiled_ins, const_ins, out_cols, out_dtype):
    """Row-tiled pallas_call: `tiled_ins` are (M, *) activations tiled (and
    pipelined) over the M grid axis; `const_ins` are VMEM-resident,
    single-buffered weights.  M is padded to the tile if irregular."""
    m = tiled_ins[0].shape[0]
    tm, mp = _row_tiling(m)
    if mp != m:
        tiled_ins = [jnp.pad(t, ((0, mp - m), (0, 0))) for t in tiled_ins]
    in_specs = [pl.BlockSpec((tm, t.shape[1]), lambda i: (i, 0)) for t in tiled_ins]
    in_specs += [_const_spec(c.shape) for c in const_ins]
    pipelined = (sum(_nbytes((tm, t.shape[1]), t.dtype) for t in tiled_ins)
                 + _nbytes((tm, out_cols), out_dtype))
    const = sum(_nbytes(c.shape, c.dtype) for c in const_ins)
    out = pl.pallas_call(
        kernel,
        out_shape=jax.ShapeDtypeStruct((mp, out_cols), out_dtype),
        grid=(mp // tm,),
        in_specs=in_specs,
        out_specs=pl.BlockSpec((tm, out_cols), lambda i: (i, 0)),
        compiler_params=pltpu.CompilerParams(
            dimension_semantics=("parallel",),
            vmem_limit_bytes=_vmem_limit(pipelined, const)),
    )(*tiled_ins, *const_ins)
    return out if mp == m else out[:m]


def dense(x, w, b, activation=None, out_dtype=None):
    n = w.shape[1]
    return _row_tiled_call(
        functools.partial(_dense_kernel, activation=activation),
        [x], [w, b.reshape(1, n)], n, out_dtype or x.dtype)


def layernorm(x, gamma, beta, eps=1e-12):
    h = x.shape[1]
    return _row_tiled_call(
        functools.partial(_ln_kernel, eps=eps),
        [x], [gamma.reshape(1, h), beta.reshape(1, h)], h, x.dtype)


def ffn_add_layernorm(x, w1, b1, w2, b2, gamma, beta, eps=1e-12):
    h = x.shape[1]
    inter = w1.shape[1]
    return _row_tiled_call(
        functools.partial(_ffn_kernel, eps=eps),
        [x],
        [w1, b1.reshape(1, inter), w2, b2.reshape(1, h),
         gamma.reshape(1, h), beta.reshape(1, h)],
        h, x.dtype)


def attention_block(qkv, residual, wo_h, bo, gamma, beta, num_heads, eps=1e-12):
    """Fused MHA + output projection + residual + LayerNorm for one layer.

    qkv:      (B, S, 3H) bf16 fused Q|K|V slab (from the QKV dense kernel)
    residual: (B, S, H)  f32  layer input
    wo_h:     (nh, dh, H) bf16 head-major output-projection weight
    returns   (B, S, H)  f32
    """
    b, s, h3 = qkv.shape
    h = h3 // 3
    dh = h // num_heads
    scale = 1.0 / math.sqrt(dh)
    # Head split as plain-JAX relayout glue: (B,S,3H) -> (B, 3*nh, S, dh),
    # Q heads first, then K, then V.
    # TODO(synk): at BERT-base sizes (dh=64) feed 128-wide head-group column
    # windows of the (B,S,3H) slab through BlockSpecs instead of this relayout;
    # at H=32 those windows would violate the 128-lane block constraint.
    qkvh = (qkv.reshape(b, s, 3, num_heads, dh)
               .transpose(0, 2, 3, 1, 4)
               .reshape(b, 3 * num_heads, s, dh))

    pipelined = (_nbytes((1, 3 * num_heads, s, dh), qkv.dtype)
                 + _nbytes((1, s, h), residual.dtype)
                 + _nbytes((1, s, h), jnp.float32))
    const = _nbytes(wo_h.shape, wo_h.dtype) + 3 * _nbytes((1, h), jnp.float32)

    return pl.pallas_call(
        functools.partial(_attn_block_kernel,
                          num_heads=num_heads, scale=scale, eps=eps),
        out_shape=jax.ShapeDtypeStruct((b, s, h), jnp.float32),
        grid=(b,),
        in_specs=[
            pl.BlockSpec((1, 3 * num_heads, s, dh), lambda i: (i, 0, 0, 0)),
            pl.BlockSpec((1, s, h), lambda i: (i, 0, 0)),
            _const_spec((num_heads, dh, h)),
            _const_spec((1, h)),
            _const_spec((1, h)),
            _const_spec((1, h)),
        ],
        out_specs=pl.BlockSpec((1, s, h), lambda i: (i, 0, 0)),
        compiler_params=pltpu.CompilerParams(
            dimension_semantics=("parallel",),
            vmem_limit_bytes=_vmem_limit(pipelined, const)),
    )(qkvh, residual, wo_h, bo.reshape(1, h), gamma.reshape(1, h),
      beta.reshape(1, h))


# ---------------------------------------------------------------------------
# Deterministic synthetic BERT parameters (stand-in for 'models/spanbert')
# ---------------------------------------------------------------------------

CFG = dict(vocab=50, max_pos=64, type_vocab=2,
           hidden=32, heads=4, intermediate=64, layers=2)


def init_bert_params(key, cfg):
    def nrm(k, shape, scale=0.02):
        return scale * jax.random.normal(k, shape, jnp.float32)

    h, inter = cfg["hidden"], cfg["intermediate"]
    keys = iter(jax.random.split(key, 3 + 6 * cfg["layers"]))
    params = {
        "word_emb": nrm(next(keys), (cfg["vocab"], h)),
        "pos_emb":  nrm(next(keys), (cfg["max_pos"], h)),
        "type_emb": nrm(next(keys), (cfg["type_vocab"], h)),
        "emb_ln_g": jnp.ones((h,), jnp.float32),
        "emb_ln_b": jnp.zeros((h,), jnp.float32),
        "layers": [],
    }
    for _ in range(cfg["layers"]):
        params["layers"].append({
            "wq": nrm(next(keys), (h, h)), "bq": jnp.zeros((h,), jnp.float32),
            "wk": nrm(next(keys), (h, h)), "bk": jnp.zeros((h,), jnp.float32),
            "wv": nrm(next(keys), (h, h)), "bv": jnp.zeros((h,), jnp.float32),
            "wo": nrm(next(keys), (h, h)), "bo": jnp.zeros((h,), jnp.float32),
            "ln1_g": jnp.ones((h,), jnp.float32), "ln1_b": jnp.zeros((h,), jnp.float32),
            "w1": nrm(next(keys), (h, inter)), "b1": jnp.zeros((inter,), jnp.float32),
            "w2": nrm(next(keys), (inter, h)), "b2": jnp.zeros((h,), jnp.float32),
            "ln2_g": jnp.ones((h,), jnp.float32), "ln2_b": jnp.zeros((h,), jnp.float32),
        })
    return params


def prepare_params(raw, cfg):
    """One-time kernel-ready parameter prep: fuse QKV weights, reshape the
    output projection head-major, and pre-cast all matmul weights to bf16 so
    kernels never DMA f32 weights or cast them per tile."""
    h, nh = cfg["hidden"], cfg["heads"]
    dh = h // nh
    prepared = {k: raw[k] for k in
                ("word_emb", "pos_emb", "type_emb", "emb_ln_g", "emb_ln_b")}
    prepared["layers"] = []
    for lyr in raw["layers"]:
        prepared["layers"].append({
            "wqkv": jnp.concatenate([lyr["wq"], lyr["wk"], lyr["wv"]],
                                    axis=1).astype(jnp.bfloat16),
            "bqkv": jnp.concatenate([lyr["bq"], lyr["bk"], lyr["bv"]]),
            "wo_h": lyr["wo"].reshape(nh, dh, h).astype(jnp.bfloat16),
            "bo": lyr["bo"],
            "ln1_g": lyr["ln1_g"], "ln1_b": lyr["ln1_b"],
            "w1": lyr["w1"].astype(jnp.bfloat16), "b1": lyr["b1"],
            "w2": lyr["w2"].astype(jnp.bfloat16), "b2": lyr["b2"],
            "ln2_g": lyr["ln2_g"], "ln2_b": lyr["ln2_b"],
        })
    return prepared


# ---------------------------------------------------------------------------
# SpanEncoder.forward: (batch, seq) int ids -> (batch, seq, hidden)
# ---------------------------------------------------------------------------

def span_encoder_forward(params, seqs, cfg=CFG):
    b, s = seqs.shape
    h, nh = cfg["hidden"], cfg["heads"]
    m = b * s

    # Embeddings: gather glue in plain JAX, Pallas LayerNorm.  token_type_ids
    # default to 0 and attention_mask defaults to all-ones, matching
    # BertModel(seqs) called with no extra arguments.
    word = params["word_emb"][seqs]                         # (B, S, H)
    pos = params["pos_emb"][:s][None, :, :]                 # (1, S, H)
    typ = params["type_emb"][0][None, None, :]              # (1, 1, H)
    x = (word + pos + typ).reshape(m, h)
    x = layernorm(x, params["emb_ln_g"], params["emb_ln_b"])

    for lyr in params["layers"]:
        # 1) fused QKV projection, emitted in bf16 (it only feeds matmuls).
        qkv = dense(x, lyr["wqkv"], lyr["bqkv"], out_dtype=jnp.bfloat16)  # (M, 3H)
        # 2) fused attention + output projection + residual + LayerNorm.
        x = attention_block(qkv.reshape(b, s, 3 * h), x.reshape(b, s, h),
                            lyr["wo_h"], lyr["bo"], lyr["ln1_g"], lyr["ln1_b"],
                            nh).reshape(m, h)
        # 3) fused FFN (gelu dense -> dense) + residual + LayerNorm.
        x = ffn_add_layernorm(x, lyr["w1"], lyr["b1"], lyr["w2"], lyr["b2"],
                              lyr["ln2_g"], lyr["ln2_b"])
    return x.reshape(b, s, h)


if __name__ == "__main__":
    key = jax.random.PRNGKey(0)
    k_param, k_ids = jax.random.split(key)

    params = prepare_params(init_bert_params(k_param, CFG), CFG)
    batch, seq = 2, 8
    seqs = jax.random.randint(k_ids, (batch, seq), 0, CFG["vocab"], dtype=jnp.int32)

    fwd = jax.jit(span_encoder_forward)
    out = jax.block_until_ready(fwd(params, seqs))

    assert out.shape == (batch, seq, CFG["hidden"]), out.shape
    assert out.dtype == jnp.float32
    assert bool(jnp.all(jnp.isfinite(out)))
    print("KERNEL_OK")
</pallas_src>

<mosaic_0001>
module attributes {stable_mosaic.version = 11 : i64} {
  func.func @_dense_kernel(%arg0: i32, %arg1: memref<8x32xf32, #tpu.memory_space<vmem>>, %arg2: memref<32x96xbf16, #tpu.memory_space<vmem>>, %arg3: memref<1x96xf32, #tpu.memory_space<vmem>>, %arg4: memref<8x96xbf16, #tpu.memory_space<vmem>>) attributes {dimension_semantics = [#tpu.dimension_semantics<parallel>], iteration_bounds = array<i64: 2>, scalar_prefetch = 0 : i64, scratch_operands = 0 : i64, tpu.core_type = #tpu.core_type<tc>, window_params = [{transform_indices = @transform_0, window_bounds = array<i64: 8, 32>}, {pipeline_mode = #tpu.pipeline_mode<synchronous>, transform_indices = @transform_1, window_bounds = array<i64: 32, 96>}, {pipeline_mode = #tpu.pipeline_mode<synchronous>, transform_indices = @transform_2, window_bounds = array<i64: 1, 96>}, {transform_indices = @transform_3, window_bounds = array<i64: 8, 96>}]} {
    %c0 = arith.constant 0 : index
    %c0_0 = arith.constant 0 : index
    %0 = vector.load %arg1[%c0, %c0_0] : memref<8x32xf32, #tpu.memory_space<vmem>>, vector<8x32xf32>
    %c0_1 = arith.constant 0 : index
    %c0_2 = arith.constant 0 : index
    %1 = vector.load %arg2[%c0_1, %c0_2] : memref<32x96xbf16, #tpu.memory_space<vmem>>, vector<32x96xbf16>
    %2 = arith.truncf %0 : vector<8x32xf32> to vector<8x32xbf16>
    %cst = arith.constant dense<0.000000e+00> : vector<8x96xf32>
    %3 = tpu.matmul %2, %1, %cst {dimension_numbers = #tpu.dot_dimension_numbers<[1], [0], [0], [1], [0, 0, 1, 1], [], []>} : vector<8x32xbf16>, vector<32x96xbf16>, vector<8x96xf32> -> vector<8x96xf32>
    %c0_3 = arith.constant 0 : index
    %c0_4 = arith.constant 0 : index
    %4 = vector.load %arg3[%c0_3, %c0_4] : memref<1x96xf32, #tpu.memory_space<vmem>>, vector<1x96xf32>
    %5 = vector.broadcast %4 : vector<1x96xf32> to vector<8x96xf32>
    %6 = arith.addf %3, %5 : vector<8x96xf32>
    %7 = arith.truncf %6 : vector<8x96xf32> to vector<8x96xbf16>
    %c0_5 = arith.constant 0 : index
    %c0_6 = arith.constant 0 : index
    %8 = vector.load %arg4[%c0_5, %c0_6] : memref<8x96xbf16, #tpu.memory_space<vmem>>, vector<8x96xbf16>
    tpu.vector_store %arg4[%c0_5, %c0_6], %7 {strides = array<i32>} : memref<8x96xbf16, #tpu.memory_space<vmem>>, vector<8x96xbf16>,
    return
  }
  func.func @transform_0(%arg0: i32) -> (i32, i32) {
    %c0_i32 = arith.constant 0 : i32
    %c0_i32_0 = arith.constant 0 : i32
    return %arg0, %c0_i32 : i32, i32
  }
  func.func @transform_1(%arg0: i32) -> (i32, i32) {
    %c0_i32 = arith.constant 0 : i32
    %c0_i32_0 = arith.constant 0 : i32
    %c0_i32_1 = arith.constant 0 : i32
    return %c0_i32, %c0_i32_0 : i32, i32
  }
  func.func @transform_2(%arg0: i32) -> (i32, i32) {
    %c0_i32 = arith.constant 0 : i32
    %c0_i32_0 = arith.constant 0 : i32
    %c0_i32_1 = arith.constant 0 : i32
    return %c0_i32, %c0_i32_0 : i32, i32
  }
  func.func @transform_3(%arg0: i32) -> (i32, i32) {
    %c0_i32 = arith.constant 0 : i32
    %c0_i32_0 = arith.constant 0 : i32
    return %arg0, %c0_i32 : i32, i32
  }
}

module attributes {stable_mosaic.version = 11 : i64} {
  func.func @_ln_kernel(%arg0: i32, %arg1: memref<8x32xf32, #tpu.memory_space<vmem>>, %arg2: memref<1x32xf32, #tpu.memory_space<vmem>>, %arg3: memref<1x32xf32, #tpu.memory_space<vmem>>, %arg4: memref<8x32xf32, #tpu.memory_space<vmem>>) attributes {dimension_semantics = [#tpu.dimension_semantics<parallel>], iteration_bounds = array<i64: 2>, scalar_prefetch = 0 : i64, scratch_operands = 0 : i64, tpu.core_type = #tpu.core_type<tc>, window_params = [{transform_indices = @transform_0, window_bounds = array<i64: 8, 32>}, {pipeline_mode = #tpu.pipeline_mode<synchronous>, transform_indices = @transform_1, window_bounds = array<i64: 1, 32>}, {pipeline_mode = #tpu.pipeline_mode<synchronous>, transform_indices = @transform_2, window_bounds = array<i64: 1, 32>}, {transform_indices = @transform_3, window_bounds = array<i64: 8, 32>}]} {
    %c0 = arith.constant 0 : index
    %c0_0 = arith.constant 0 : index
    %0 = vector.load %arg1[%c0, %c0_0] : memref<8x32xf32, #tpu.memory_space<vmem>>, vector<8x32xf32>
    %c0_1 = arith.constant 0 : index
    %c0_2 = arith.constant 0 : index
    %1 = vector.load %arg2[%c0_1, %c0_2] : memref<1x32xf32, #tpu.memory_space<vmem>>, vector<1x32xf32>
    %c0_3 = arith.constant 0 : index
    %c0_4 = arith.constant 0 : index
    %2 = vector.load %arg3[%c0_3, %c0_4] : memref<1x32xf32, #tpu.memory_space<vmem>>, vector<1x32xf32>
    %cst = arith.constant dense<0.000000e+00> : vector<8xf32>
    %3 = vector.multi_reduction <add>, %0, %cst [1] : vector<8x32xf32> to vector<8xf32>
    %4 = vector.shape_cast %3 : vector<8xf32> to vector<8x1xf32>
    %cst_5 = arith.constant 3.200000e+01 : f32
    %5 = vector.broadcast %cst_5 : f32 to vector<8x1xf32>
    %6 = arith.divf %4, %5 : vector<8x1xf32>
    %7 = vector.broadcast %6 : vector<8x1xf32> to vector<8x32xf32>
    %8 = arith.subf %0, %7 : vector<8x32xf32>
    %9 = arith.mulf %8, %8 : vector<8x32xf32>
    %cst_6 = arith.constant dense<0.000000e+00> : vector<8xf32>
    %10 = vector.multi_reduction <add>, %9, %cst_6 [1] : vector<8x32xf32> to vector<8xf32>
    %11 = vector.shape_cast %10 : vector<8xf32> to vector<8x1xf32>
    %cst_7 = arith.constant 3.200000e+01 : f32
    %12 = vector.broadcast %cst_7 : f32 to vector<8x1xf32>
    %13 = arith.divf %11, %12 : vector<8x1xf32>
    %cst_8 = arith.constant 9.99999996E-13 : f32
    %14 = vector.broadcast %cst_8 : f32 to vector<8x1xf32>
    %15 = arith.addf %13, %14 : vector<8x1xf32>
    %16 = math.rsqrt %15 : vector<8x1xf32>
    %17 = vector.broadcast %16 : vector<8x1xf32> to vector<8x32xf32>
    %18 = arith.mulf %8, %17 : vector<8x32xf32>
    %19 = vector.broadcast %1 : vector<1x32xf32> to vector<8x32xf32>
    %20 = arith.mulf %18, %19 : vector<8x32xf32>
    %21 = vector.broadcast %2 : vector<1x32xf32> to vector<8x32xf32>
    %22 = arith.addf %20, %21 : vector<8x32xf32>
    %c0_9 = arith.constant 0 : index
    %c0_10 = arith.constant 0 : index
    %23 = vector.load %arg4[%c0_9, %c0_10] : memref<8x32xf32, #tpu.memory_space<vmem>>, vector<8x32xf32>
    tpu.vector_store %arg4[%c0_9, %c0_10], %22 {strides = array<i32>} : memref<8x32xf32, #tpu.memory_space<vmem>>, vector<8x32xf32>,
    return
  }
  func.func @transform_0(%arg0: i32) -> (i32, i32) {
    %c0_i32 = arith.constant 0 : i32
    %c0_i32_0 = arith.constant 0 : i32
    return %arg0, %c0_i32 : i32, i32
  }
  func.func @transform_1(%arg0: i32) -> (i32, i32) {
    %c0_i32 = arith.constant 0 : i32
    %c0_i32_0 = arith.constant 0 : i32
    %c0_i32_1 = arith.constant 0 : i32
    return %c0_i32, %c0_i32_0 : i32, i32
  }
  func.func @transform_2(%arg0: i32) -> (i32, i32) {
    %c0_i32 = arith.constant 0 : i32
    %c0_i32_0 = arith.constant 0 : i32
    %c0_i32_1 = arith.constant 0 : i32
    return %c0_i32, %c0_i32_0 : i32, i32
  }
  func.func @transform_3(%arg0: i32) -> (i32, i32) {
    %c0_i32 = arith.constant 0 : i32
    %c0_i32_0 = arith.constant 0 : i32
    return %arg0, %c0_i32 : i32, i32
  }
}

module attributes {stable_mosaic.version = 11 : i64} {
  func.func @_attn_block_kernel(%arg0: i32, %arg1: memref<1x12x8x8xbf16, #tpu.memory_space<vmem>>, %arg2: memref<1x8x32xf32, #tpu.memory_space<vmem>>, %arg3: memref<4x8x32xbf16, #tpu.memory_space<vmem>>, %arg4: memref<1x32xf32, #tpu.memory_space<vmem>>, %arg5: memref<1x32xf32, #tpu.memory_space<vmem>>, %arg6: memref<1x32xf32, #tpu.memory_space<vmem>>, %arg7: memref<1x8x32xf32, #tpu.memory_space<vmem>>) attributes {dimension_semantics = [#tpu.dimension_semantics<parallel>], iteration_bounds = array<i64: 2>, scalar_prefetch = 0 : i64, scratch_operands = 0 : i64, tpu.core_type = #tpu.core_type<tc>, window_params = [{transform_indices = @transform_0, window_bounds = array<i64: 1, 12, 8, 8>}, {transform_indices = @transform_1, window_bounds = array<i64: 1, 8, 32>}, {pipeline_mode = #tpu.pipeline_mode<synchronous>, transform_indices = @transform_2, window_bounds = array<i64: 4, 8, 32>}, {pipeline_mode = #tpu.pipeline_mode<synchronous>, transform_indices = @transform_3, window_bounds = array<i64: 1, 32>}, {pipeline_mode = #tpu.pipeline_mode<synchronous>, transform_indices = @transform_4, window_bounds = array<i64: 1, 32>}, {pipeline_mode = #tpu.pipeline_mode<synchronous>, transform_indices = @transform_5, window_bounds = array<i64: 1, 32>}, {transform_indices = @transform_6, window_bounds = array<i64: 1, 8, 32>}]} {
    %c0 = arith.constant 0 : index
    %c0_0 = arith.constant 0 : index
    %c0_1 = arith.constant 0 : index
    %c0_2 = arith.constant 0 : index
    %0 = vector.load %arg1[%c0, %c0_0, %c0_1, %c0_2] : memref<1x12x8x8xbf16, #tpu.memory_space<vmem>>, vector<1x12x8x8xbf16>
    %1 = vector.shape_cast %0 : vector<1x12x8x8xbf16> to vector<12x8x8xbf16>
    %2 = vector.extract_strided_slice %1 {offsets = [0, 0, 0], sizes = [4, 8, 8], strides = [1, 1, 1]} : vector<12x8x8xbf16> to vector<4x8x8xbf16>
    %cst = arith.constant 3.535160e-01 : bf16
    %3 = vector.broadcast %cst : bf16 to vector<4x8x8xbf16>
    %4 = arith.mulf %2, %3 : vector<4x8x8xbf16>
    %5 = vector.extract_strided_slice %1 {offsets = [4, 0, 0], sizes = [4, 8, 8], strides = [1, 1, 1]} : vector<12x8x8xbf16> to vector<4x8x8xbf16>
    %6 = vector.extract_strided_slice %1 {offsets = [8, 0, 0], sizes = [4, 8, 8], strides = [1, 1, 1]} : vector<12x8x8xbf16> to vector<4x8x8xbf16>
    "tpu.trace_start"() <{level = 10 : i32, message = "hqd,hkd->hqk"}> : () -> ()
    %cst_3 = arith.constant dense<0.000000e+00> : vector<4x8x8xf32>
    %7 = tpu.matmul %4, %5, %cst_3 {dimension_numbers = #tpu.dot_dimension_numbers<[2], [2], [1], [1], [0, 0, 0, 1, 1, 1], [0], [0]>} : vector<4x8x8xbf16>, vector<4x8x8xbf16>, vector<4x8x8xf32> -> vector<4x8x8xf32>
    "tpu.trace_stop"() : () -> ()
    %cst_4 = arith.constant dense<0xFF800000> : vector<4x8xf32>
    %8 = vector.multi_reduction <maximumf>, %7, %cst_4 [2] : vector<4x8x8xf32> to vector<4x8xf32>
    %9 = vector.shape_cast %8 : vector<4x8xf32> to vector<4x8x1xf32>
    %10 = vector.broadcast %9 : vector<4x8x1xf32> to vector<4x8x8xf32>
    %11 = arith.subf %7, %10 : vector<4x8x8xf32>
    %12 = math.exp %11 : vector<4x8x8xf32>
    %cst_5 = arith.constant dense<0.000000e+00> : vector<4x8xf32>
    %13 = vector.multi_reduction <add>, %12, %cst_5 [2] : vector<4x8x8xf32> to vector<4x8xf32>
    %14 = vector.shape_cast %13 : vector<4x8xf32> to vector<4x8x1xf32>
    %15 = tpu.reciprocal %14 {approx = true} : vector<4x8x1xf32> -> vector<4x8x1xf32>
    %16 = vector.broadcast %15 : vector<4x8x1xf32> to vector<4x8x8xf32>
    %17 = arith.mulf %12, %16 : vector<4x8x8xf32>
    %18 = arith.truncf %17 : vector<4x8x8xf32> to vector<4x8x8xbf16>
    "tpu.trace_start"() <{level = 10 : i32, message = "hqk,hkd->hqd"}> : () -> ()
    %cst_6 = arith.constant dense<0.000000e+00> : vector<4x8x8xf32>
    %19 = tpu.matmul %18, %6, %cst_6 {dimension_numbers = #tpu.dot_dimension_numbers<[2], [1], [1], [2], [0, 0, 0, 1, 1, 2], [0], [0]>} : vector<4x8x8xbf16>, vector<4x8x8xbf16>, vector<4x8x8xf32> -> vector<4x8x8xf32>
    "tpu.trace_stop"() : () -> ()
    %c0_7 = arith.constant 0 : index
    %c0_8 = arith.constant 0 : index
    %c0_9 = arith.constant 0 : index
    %20 = vector.load %arg2[%c0_7, %c0_8, %c0_9] : memref<1x8x32xf32, #tpu.memory_space<vmem>>, vector<1x8x32xf32>
    %21 = vector.shape_cast %20 : vector<1x8x32xf32> to vector<8x32xf32>
    %c0_10 = arith.constant 0 : index
    %c0_11 = arith.constant 0 : index
    %22 = vector.load %arg4[%c0_10, %c0_11] : memref<1x32xf32, #tpu.memory_space<vmem>>, vector<1x32xf32>
    %23 = vector.broadcast %22 : vector<1x32xf32> to vector<8x32xf32>
    %24 = arith.addf %21, %23 : vector<8x32xf32>
    %25 = vector.extract_strided_slice %19 {offsets = [0, 0, 0], sizes = [1, 8, 8], strides = [1, 1, 1]} : vector<4x8x8xf32> to vector<1x8x8xf32>
    %26 = vector.shape_cast %25 : vector<1x8x8xf32> to vector<8x8xf32>
    %27 = arith.truncf %26 : vector<8x8xf32> to vector<8x8xbf16>
    %c0_12 = arith.constant 0 : index
    %c0_13 = arith.constant 0 : index
    %c0_14 = arith.constant 0 : index
    %28 = vector.load %arg3[%c0_12, %c0_13, %c0_14] : memref<4x8x32xbf16, #tpu.memory_space<vmem>>, vector<1x8x32xbf16>
    %29 = vector.shape_cast %28 : vector<1x8x32xbf16> to vector<8x32xbf16>
    %cst_15 = arith.constant dense<0.000000e+00> : vector<8x32xf32>
    %30 = tpu.matmul %27, %29, %cst_15 {dimension_numbers = #tpu.dot_dimension_numbers<[1], [0], [0], [1], [0, 0, 1, 1], [], []>} : vector<8x8xbf16>, vector<8x32xbf16>, vector<8x32xf32> -> vector<8x32xf32>
    %31 = arith.addf %24, %30 : vector<8x32xf32>
    %32 = vector.extract_strided_slice %19 {offsets = [1, 0, 0], sizes = [1, 8, 8], strides = [1, 1, 1]} : vector<4x8x8xf32> to vector<1x8x8xf32>
    %33 = vector.shape_cast %32 : vector<1x8x8xf32> to vector<8x8xf32>
    %34 = arith.truncf %33 : vector<8x8xf32> to vector<8x8xbf16>
    %c1 = arith.constant 1 : index
    %c0_16 = arith.constant 0 : index
    %c0_17 = arith.constant 0 : index
    %35 = vector.load %arg3[%c1, %c0_16, %c0_17] : memref<4x8x32xbf16, #tpu.memory_space<vmem>>, vector<1x8x32xbf16>
    %36 = vector.shape_cast %35 : vector<1x8x32xbf16> to vector<8x32xbf16>
    %cst_18 = arith.constant dense<0.000000e+00> : vector<8x32xf32>
    %37 = tpu.matmul %34, %36, %cst_18 {dimension_numbers = #tpu.dot_dimension_numbers<[1], [0], [0], [1], [0, 0, 1, 1], [], []>} : vector<8x8xbf16>, vector<8x32xbf16>, vector<8x32xf32> -> vector<8x32xf32>
    %38 = arith.addf %31, %37 : vector<8x32xf32>
    %39 = vector.extract_strided_slice %19 {offsets = [2, 0, 0], sizes = [1, 8, 8], strides = [1, 1, 1]} : vector<4x8x8xf32> to vector<1x8x8xf32>
    %40 = vector.shape_cast %39 : vector<1x8x8xf32> to vector<8x8xf32>
    %41 = arith.truncf %40 : vector<8x8xf32> to vector<8x8xbf16>
    %c2 = arith.constant 2 : index
    %c0_19 = arith.constant 0 : index
    %c0_20 = arith.constant 0 : index
    %42 = vector.load %arg3[%c2, %c0_19, %c0_20] : memref<4x8x32xbf16, #tpu.memory_space<vmem>>, vector<1x8x32xbf16>
    %43 = vector.shape_cast %42 : vector<1x8x32xbf16> to vector<8x32xbf16>
    %cst_21 = arith.constant dense<0.000000e+00> : vector<8x32xf32>
    %44 = tpu.matmul %41, %43, %cst_21 {dimension_numbers = #tpu.dot_dimension_numbers<[1], [0], [0], [1], [0, 0, 1, 1], [], []>} : vector<8x8xbf16>, vector<8x32xbf16>, vector<8x32xf32> -> vector<8x32xf32>
    %45 = arith.addf %38, %44 : vector<8x32xf32>
    %46 = vector.extract_strided_slice %19 {offsets = [3, 0, 0], sizes = [1, 8, 8], strides = [1, 1, 1]} : vector<4x8x8xf32> to vector<1x8x8xf32>
    %47 = vector.shape_cast %46 : vector<1x8x8xf32> to vector<8x8xf32>
    %48 = arith.truncf %47 : vector<8x8xf32> to vector<8x8xbf16>
    %c3 = arith.constant 3 : index
    %c0_22 = arith.constant 0 : index
    %c0_23 = arith.constant 0 : index
    %49 = vector.load %arg3[%c3, %c0_22, %c0_23] : memref<4x8x32xbf16, #tpu.memory_space<vmem>>, vector<1x8x32xbf16>
    %50 = vector.shape_cast %49 : vector<1x8x32xbf16> to vector<8x32xbf16>
    %cst_24 = arith.constant dense<0.000000e+00> : vector<8x32xf32>
    %51 = tpu.matmul %48, %50, %cst_24 {dimension_numbers = #tpu.dot_dimension_numbers<[1], [0], [0], [1], [0, 0, 1, 1], [], []>} : vector<8x8xbf16>, vector<8x32xbf16>, vector<8x32xf32> -> vector<8x32xf32>
    %52 = arith.addf %45, %51 : vector<8x32xf32>
    %c0_25 = arith.constant 0 : index
    %c0_26 = arith.constant 0 : index
    %53 = vector.load %arg5[%c0_25, %c0_26] : memref<1x32xf32, #tpu.memory_space<vmem>>, vector<1x32xf32>
    %c0_27 = arith.constant 0 : index
    %c0_28 = arith.constant 0 : index
    %54 = vector.load %arg6[%c0_27, %c0_28] : memref<1x32xf32, #tpu.memory_space<vmem>>, vector<1x32xf32>
    %cst_29 = arith.constant dense<0.000000e+00> : vector<8xf32>
    %55 = vector.multi_reduction <add>, %52, %cst_29 [1] : vector<8x32xf32> to vector<8xf32>
    %56 = vector.shape_cast %55 : vector<8xf32> to vector<8x1xf32>
    %cst_30 = arith.constant 3.200000e+01 : f32
    %57 = vector.broadcast %cst_30 : f32 to vector<8x1xf32>
    %58 = arith.divf %56, %57 : vector<8x1xf32>
    %59 = vector.broadcast %58 : vector<8x1xf32> to vector<8x32xf32>
    %60 = arith.subf %52, %59 : vector<8x32xf32>
    %61 = arith.mulf %60, %60 : vector<8x32xf32>
    %cst_31 = arith.constant dense<0.000000e+00> : vector<8xf32>
    %62 = vector.multi_reduction <add>, %61, %cst_31 [1] : vector<8x32xf32> to vector<8xf32>
    %63 = vector.shape_cast %62 : vector<8xf32> to vector<8x1xf32>
    %cst_32 = arith.constant 3.200000e+01 : f32
    %64 = vector.broadcast %cst_32 : f32 to vector<8x1xf32>
    %65 = arith.divf %63, %64 : vector<8x1xf32>
    %cst_33 = arith.constant 9.99999996E-13 : f32
    %66 = vector.broadcast %cst_33 : f32 to vector<8x1xf32>
    %67 = arith.addf %65, %66 : vector<8x1xf32>
    %68 = math.rsqrt %67 : vector<8x1xf32>
    %69 = vector.broadcast %68 : vector<8x1xf32> to vector<8x32xf32>
    %70 = arith.mulf %60, %69 : vector<8x32xf32>
    %71 = vector.broadcast %53 : vector<1x32xf32> to vector<8x32xf32>
    %72 = arith.mulf %70, %71 : vector<8x32xf32>
    %73 = vector.broadcast %54 : vector<1x32xf32> to vector<8x32xf32>
    %74 = arith.addf %72, %73 : vector<8x32xf32>
    %c0_34 = arith.constant 0 : index
    %c0_35 = arith.constant 0 : index
    %c0_36 = arith.constant 0 : index
    %75 = vector.load %arg7[%c0_34, %c0_35, %c0_36] : memref<1x8x32xf32, #tpu.memory_space<vmem>>, vector<1x8x32xf32>
    %76 = vector.shape_cast %75 : vector<1x8x32xf32> to vector<8x32xf32>
    %77 = vector.shape_cast %74 : vector<8x32xf32> to vector<1x8x32xf32>
    tpu.vector_store %arg7[%c0_34, %c0_35, %c0_36], %77 {strides = array<i32>} : memref<1x8x32xf32, #tpu.memory_space<vmem>>, vector<1x8x32xf32>,
    return
  }
  func.func @transform_0(%arg0: i32) -> (i32, i32, i32, i32) {
    %c0_i32 = arith.constant 0 : i32
    %c0_i32_0 = arith.constant 0 : i32
    %c0_i32_1 = arith.constant 0 : i32
    %c0_i32_2 = arith.constant 0 : i32
    return %arg0, %c0_i32, %c0_i32_0, %c0_i32_1 : i32, i32, i32, i32
  }
  func.func @transform_1(%arg0: i32) -> (i32, i32, i32) {
    %c0_i32 = arith.constant 0 : i32
    %c0_i32_0 = arith.constant 0 : i32
    %c0_i32_1 = arith.constant 0 : i32
    return %arg0, %c0_i32, %c0_i32_0 : i32, i32, i32
  }
  func.func @transform_2(%arg0: i32) -> (i32, i32, i32) {
    %c0_i32 = arith.constant 0 : i32
    %c0_i32_0 = arith.constant 0 : i32
    %c0_i32_1 = arith.constant 0 : i32
    %c0_i32_2 = arith.constant 0 : i32
    return %c0_i32, %c0_i32_0, %c0_i32_1 : i32, i32, i32
  }
  func.func @transform_3(%arg0: i32) -> (i32, i32) {
    %c0_i32 = arith.constant 0 : i32
    %c0_i32_0 = arith.constant 0 : i32
    %c0_i32_1 = arith.constant 0 : i32
    return %c0_i32, %c0_i32_0 : i32, i32
  }
  func.func @transform_4(%arg0: i32) -> (i32, i32) {
    %c0_i32 = arith.constant 0 : i32
    %c0_i32_0 = arith.constant 0 : i32
    %c0_i32_1 = arith.constant 0 : i32
    return %c0_i32, %c0_i32_0 : i32, i32
  }
  func.func @transform_5(%arg0: i32) -> (i32, i32) {
    %c0_i32 = arith.constant 0 : i32
    %c0_i32_0 = arith.constant 0 : i32
    %c0_i32_1 = arith.constant 0 : i32
    return %c0_i32, %c0_i32_0 : i32, i32
  }
  func.func @transform_6(%arg0: i32) -> (i32, i32, i32) {
    %c0_i32 = arith.constant 0 : i32
    %c0_i32_0 = arith.constant 0 : i32
    %c0_i32_1 = arith.constant 0 : i32
    return %arg0, %c0_i32, %c0_i32_0 : i32, i32, i32
  }
}

module attributes {stable_mosaic.version = 11 : i64} {
  func.func @_ffn_kernel(%arg0: i32, %arg1: memref<8x32xf32, #tpu.memory_space<vmem>>, %arg2: memref<32x64xbf16, #tpu.memory_space<vmem>>, %arg3: memref<1x64xf32, #tpu.memory_space<vmem>>, %arg4: memref<64x32xbf16, #tpu.memory_space<vmem>>, %arg5: memref<1x32xf32, #tpu.memory_space<vmem>>, %arg6: memref<1x32xf32, #tpu.memory_space<vmem>>, %arg7: memref<1x32xf32, #tpu.memory_space<vmem>>, %arg8: memref<8x32xf32, #tpu.memory_space<vmem>>) attributes {dimension_semantics = [#tpu.dimension_semantics<parallel>], iteration_bounds = array<i64: 2>, scalar_prefetch = 0 : i64, scratch_operands = 0 : i64, tpu.core_type = #tpu.core_type<tc>, window_params = [{transform_indices = @transform_0, window_bounds = array<i64: 8, 32>}, {pipeline_mode = #tpu.pipeline_mode<synchronous>, transform_indices = @transform_1, window_bounds = array<i64: 32, 64>}, {pipeline_mode = #tpu.pipeline_mode<synchronous>, transform_indices = @transform_2, window_bounds = array<i64: 1, 64>}, {pipeline_mode = #tpu.pipeline_mode<synchronous>, transform_indices = @transform_3, window_bounds = array<i64: 64, 32>}, {pipeline_mode = #tpu.pipeline_mode<synchronous>, transform_indices = @transform_4, window_bounds = array<i64: 1, 32>}, {pipeline_mode = #tpu.pipeline_mode<synchronous>, transform_indices = @transform_5, window_bounds = array<i64: 1, 32>}, {pipeline_mode = #tpu.pipeline_mode<synchronous>, transform_indices = @transform_6, window_bounds = array<i64: 1, 32>}, {transform_indices = @transform_7, window_bounds = array<i64: 8, 32>}]} {
    %c0 = arith.constant 0 : index
    %c0_0 = arith.constant 0 : index
    %0 = vector.load %arg1[%c0, %c0_0] : memref<8x32xf32, #tpu.memory_space<vmem>>, vector<8x32xf32>
    %c0_1 = arith.constant 0 : index
    %c0_2 = arith.constant 0 : index
    %1 = vector.load %arg2[%c0_1, %c0_2] : memref<32x64xbf16, #tpu.memory_space<vmem>>, vector<32x64xbf16>
    %2 = arith.truncf %0 : vector<8x32xf32> to vector<8x32xbf16>
    %cst = arith.constant dense<0.000000e+00> : vector<8x64xf32>
    %3 = tpu.matmul %2, %1, %cst {dimension_numbers = #tpu.dot_dimension_numbers<[1], [0], [0], [1], [0, 0, 1, 1], [], []>} : vector<8x32xbf16>, vector<32x64xbf16>, vector<8x64xf32> -> vector<8x64xf32>
    %c0_3 = arith.constant 0 : index
    %c0_4 = arith.constant 0 : index
    %4 = vector.load %arg3[%c0_3, %c0_4] : memref<1x64xf32, #tpu.memory_space<vmem>>, vector<1x64xf32>
    %5 = vector.broadcast %4 : vector<1x64xf32> to vector<8x64xf32>
    %6 = arith.addf %3, %5 : vector<8x64xf32>
    %cst_5 = arith.constant 5.000000e-01 : f32
    %7 = vector.broadcast %cst_5 : f32 to vector<8x64xf32>
    %8 = arith.mulf %7, %6 : vector<8x64xf32>
    %cst_6 = arith.constant 4.471500e-02 : f32
    %9 = vector.broadcast %cst_6 : f32 to vector<8x64xf32>
    %10 = arith.mulf %9, %6 : vector<8x64xf32>
    %11 = arith.mulf %10, %6 : vector<8x64xf32>
    %12 = arith.mulf %11, %6 : vector<8x64xf32>
    %13 = arith.addf %6, %12 : vector<8x64xf32>
    %cst_7 = arith.constant 0.797884583 : f32
    %14 = vector.broadcast %cst_7 : f32 to vector<8x64xf32>
    %15 = arith.mulf %14, %13 : vector<8x64xf32>
    %16 = math.tanh %15 : vector<8x64xf32>
    %cst_8 = arith.constant 1.000000e+00 : f32
    %17 = vector.broadcast %cst_8 : f32 to vector<8x64xf32>
    %18 = arith.addf %17, %16 : vector<8x64xf32>
    %19 = arith.mulf %8, %18 : vector<8x64xf32>
    %20 = arith.truncf %19 : vector<8x64xf32> to vector<8x64xbf16>
    %c0_9 = arith.constant 0 : index
    %c0_10 = arith.constant 0 : index
    %21 = vector.load %arg4[%c0_9, %c0_10] : memref<64x32xbf16, #tpu.memory_space<vmem>>, vector<64x32xbf16>
    %cst_11 = arith.constant dense<0.000000e+00> : vector<8x32xf32>
    %22 = tpu.matmul %20, %21, %cst_11 {dimension_numbers = #tpu.dot_dimension_numbers<[1], [0], [0], [1], [0, 0, 1, 1], [], []>} : vector<8x64xbf16>, vector<64x32xbf16>, vector<8x32xf32> -> vector<8x32xf32>
    %c0_12 = arith.constant 0 : index
    %c0_13 = arith.constant 0 : index
    %23 = vector.load %arg5[%c0_12, %c0_13] : memref<1x32xf32, #tpu.memory_space<vmem>>, vector<1x32xf32>
    %24 = vector.broadcast %23 : vector<1x32xf32> to vector<8x32xf32>
    %25 = arith.addf %22, %24 : vector<8x32xf32>
    %26 = arith.addf %25, %0 : vector<8x32xf32>
    %c0_14 = arith.constant 0 : index
    %c0_15 = arith.constant 0 : index
    %27 = vector.load %arg6[%c0_14, %c0_15] : memref<1x32xf32, #tpu.memory_space<vmem>>, vector<1x32xf32>
    %c0_16 = arith.constant 0 : index
    %c0_17 = arith.constant 0 : index
    %28 = vector.load %arg7[%c0_16, %c0_17] : memref<1x32xf32, #tpu.memory_space<vmem>>, vector<1x32xf32>
    %cst_18 = arith.constant dense<0.000000e+00> : vector<8xf32>
    %29 = vector.multi_reduction <add>, %26, %cst_18 [1] : vector<8x32xf32> to vector<8xf32>
    %30 = vector.shape_cast %29 : vector<8xf32> to vector<8x1xf32>
    %cst_19 = arith.constant 3.200000e+01 : f32
    %31 = vector.broadcast %cst_19 : f32 to vector<8x1xf32>
    %32 = arith.divf %30, %31 : vector<8x1xf32>
    %33 = vector.broadcast %32 : vector<8x1xf32> to vector<8x32xf32>
    %34 = arith.subf %26, %33 : vector<8x32xf32>
    %35 = arith.mulf %34, %34 : vector<8x32xf32>
    %cst_20 = arith.constant dense<0.000000e+00> : vector<8xf32>
    %36 = vector.multi_reduction <add>, %35, %cst_20 [1] : vector<8x32xf32> to vector<8xf32>
    %37 = vector.shape_cast %36 : vector<8xf32> to vector<8x1xf32>
    %cst_21 = arith.constant 3.200000e+01 : f32
    %38 = vector.broadcast %cst_21 : f32 to vector<8x1xf32>
    %39 = arith.divf %37, %38 : vector<8x1xf32>
    %cst_22 = arith.constant 9.99999996E-13 : f32
    %40 = vector.broadcast %cst_22 : f32 to vector<8x1xf32>
    %41 = arith.addf %39, %40 : vector<8x1xf32>
    %42 = math.rsqrt %41 : vector<8x1xf32>
    %43 = vector.broadcast %42 : vector<8x1xf32> to vector<8x32xf32>
    %44 = arith.mulf %34, %43 : vector<8x32xf32>
    %45 = vector.broadcast %27 : vector<1x32xf32> to vector<8x32xf32>
    %46 = arith.mulf %44, %45 : vector<8x32xf32>
    %47 = vector.broadcast %28 : vector<1x32xf32> to vector<8x32xf32>
    %48 = arith.addf %46, %47 : vector<8x32xf32>
    %c0_23 = arith.constant 0 : index
    %c0_24 = arith.constant 0 : index
    %49 = vector.load %arg8[%c0_23, %c0_24] : memref<8x32xf32, #tpu.memory_space<vmem>>, vector<8x32xf32>
    tpu.vector_store %arg8[%c0_23, %c0_24], %48 {strides = array<i32>} : memref<8x32xf32, #tpu.memory_space<vmem>>, vector<8x32xf32>,
    return
  }
  func.func @transform_0(%arg0: i32) -> (i32, i32) {
    %c0_i32 = arith.constant 0 : i32
    %c0_i32_0 = arith.constant 0 : i32
    return %arg0, %c0_i32 : i32, i32
  }
  func.func @transform_1(%arg0: i32) -> (i32, i32) {
    %c0_i32 = arith.constant 0 : i32
    %c0_i32_0 = arith.constant 0 : i32
    %c0_i32_1 = arith.constant 0 : i32
    return %c0_i32, %c0_i32_0 : i32, i32
  }
  func.func @transform_2(%arg0: i32) -> (i32, i32) {
    %c0_i32 = arith.constant 0 : i32
    %c0_i32_0 = arith.constant 0 : i32
    %c0_i32_1 = arith.constant 0 : i32
    return %c0_i32, %c0_i32_0 : i32, i32
  }
  func.func @transform_3(%arg0: i32) -> (i32, i32) {
    %c0_i32 = arith.constant 0 : i32
    %c0_i32_0 = arith.constant 0 : i32
    %c0_i32_1 = arith.constant 0 : i32
    return %c0_i32, %c0_i32_0 : i32, i32
  }
  func.func @transform_4(%arg0: i32) -> (i32, i32) {
    %c0_i32 = arith.constant 0 : i32
    %c0_i32_0 = arith.constant 0 : i32
    %c0_i32_1 = arith.constant 0 : i32
    return %c0_i32, %c0_i32_0 : i32, i32
  }
  func.func @transform_5(%arg0: i32) -> (i32, i32) {
    %c0_i32 = arith.constant 0 : i32
    %c0_i32_0 = arith.constant 0 : i32
    %c0_i32_1 = arith.constant 0 : i32
    return %c0_i32, %c0_i32_0 : i32, i32
  }
  func.func @transform_6(%arg0: i32) -> (i32, i32) {
    %c0_i32 = arith.constant 0 : i32
    %c0_i32_0 = arith.constant 0 : i32
    %c0_i32_1 = arith.constant 0 : i32
    return %c0_i32, %c0_i32_0 : i32, i32
  }
  func.func @transform_7(%arg0: i32) -> (i32, i32) {
    %c0_i32 = arith.constant 0 : i32
    %c0_i32_0 = arith.constant 0 : i32
    return %arg0, %c0_i32 : i32, i32
  }
}

module attributes {stable_mosaic.version = 11 : i64} {
  func.func @_ffn_kernel(%arg0: i32, %arg1: memref<8x32xf32, #tpu.memory_space<vmem>>, %arg2: memref<32x64xbf16, #tpu.memory_space<vmem>>, %arg3: memref<1x64xf32, #tpu.memory_space<vmem>>, %arg4: memref<64x32xbf16, #tpu.memory_space<vmem>>, %arg5: memref<1x32xf32, #tpu.memory_space<vmem>>, %arg6: memref<1x32xf32, #tpu.memory_space<vmem>>, %arg7: memref<1x32xf32, #tpu.memory_space<vmem>>, %arg8: memref<8x32xf32, #tpu.memory_space<vmem>>) attributes {dimension_semantics = [#tpu.dimension_semantics<parallel>], iteration_bounds = array<i64: 2>, scalar_prefetch = 0 : i64, scratch_operands = 0 : i64, tpu.core_type = #tpu.core_type<tc>, window_params = [{transform_indices = @transform_0, window_bounds = array<i64: 8, 32>}, {pipeline_mode = #tpu.pipeline_mode<synchronous>, transform_indices = @transform_1, window_bounds = array<i64: 32, 64>}, {pipeline_mode = #tpu.pipeline_mode<synchronous>, transform_indices = @transform_2, window_bounds = array<i64: 1, 64>}, {pipeline_mode = #tpu.pipeline_mode<synchronous>, transform_indices = @transform_3, window_bounds = array<i64: 64, 32>}, {pipeline_mode = #tpu.pipeline_mode<synchronous>, transform_indices = @transform_4, window_bounds = array<i64: 1, 32>}, {pipeline_mode = #tpu.pipeline_mode<synchronous>, transform_indices = @transform_5, window_bounds = array<i64: 1, 32>}, {pipeline_mode = #tpu.pipeline_mode<synchronous>, transform_indices = @transform_6, window_bounds = array<i64: 1, 32>}, {transform_indices = @transform_7, window_bounds = array<i64: 8, 32>}]} {
    %c0 = arith.constant 0 : index
    %c0_0 = arith.constant 0 : index
    %0 = vector.load %arg1[%c0, %c0_0] : memref<8x32xf32, #tpu.memory_space<vmem>>, vector<8x32xf32>
    %c0_1 = arith.constant 0 : index
    %c0_2 = arith.constant 0 : index
    %1 = vector.load %arg2[%c0_1, %c0_2] : memref<32x64xbf16, #tpu.memory_space<vmem>>, vector<32x64xbf16>
    %2 = arith.truncf %0 : vector<8x32xf32> to vector<8x32xbf16>
    %cst = arith.constant dense<0.000000e+00> : vector<8x64xf32>
    %3 = tpu.matmul %2, %1, %cst {dimension_numbers = #tpu.dot_dimension_numbers<[1], [0], [0], [1], [0, 0, 1, 1], [], []>} : vector<8x32xbf16>, vector<32x64xbf16>, vector<8x64xf32> -> vector<8x64xf32>
    %c0_3 = arith.constant 0 : index
    %c0_4 = arith.constant 0 : index
    %4 = vector.load %arg3[%c0_3, %c0_4] : memref<1x64xf32, #tpu.memory_space<vmem>>, vector<1x64xf32>
    %5 = vector.broadcast %4 : vector<1x64xf32> to vector<8x64xf32>
    %6 = arith.addf %3, %5 : vector<8x64xf32>
    %cst_5 = arith.constant 5.000000e-01 : f32
    %7 = vector.broadcast %cst_5 : f32 to vector<8x64xf32>
    %8 = arith.mulf %7, %6 : vector<8x64xf32>
    %cst_6 = arith.constant 4.471500e-02 : f32
    %9 = vector.broadcast %cst_6 : f32 to vector<8x64xf32>
    %10 = arith.mulf %9, %6 : vector<8x64xf32>
    %11 = arith.mulf %10, %6 : vector<8x64xf32>
    %12 = arith.mulf %11, %6 : vector<8x64xf32>
    %13 = arith.addf %6, %12 : vector<8x64xf32>
    %cst_7 = arith.constant 0.797884583 : f32
    %14 = vector.broadcast %cst_7 : f32 to vector<8x64xf32>
    %15 = arith.mulf %14, %13 : vector<8x64xf32>
    %16 = math.tanh %15 : vector<8x64xf32>
    %cst_8 = arith.constant 1.000000e+00 : f32
    %17 = vector.broadcast %cst_8 : f32 to vector<8x64xf32>
    %18 = arith.addf %17, %16 : vector<8x64xf32>
    %19 = arith.mulf %8, %18 : vector<8x64xf32>
    %20 = arith.truncf %19 : vector<8x64xf32> to vector<8x64xbf16>
    %c0_9 = arith.constant 0 : index
    %c0_10 = arith.constant 0 : index
    %21 = vector.load %arg4[%c0_9, %c0_10] : memref<64x32xbf16, #tpu.memory_space<vmem>>, vector<64x32xbf16>
    %cst_11 = arith.constant dense<0.000000e+00> : vector<8x32xf32>
    %22 = tpu.matmul %20, %21, %cst_11 {dimension_numbers = #tpu.dot_dimension_numbers<[1], [0], [0], [1], [0, 0, 1, 1], [], []>} : vector<8x64xbf16>, vector<64x32xbf16>, vector<8x32xf32> -> vector<8x32xf32>
    %c0_12 = arith.constant 0 : index
    %c0_13 = arith.constant 0 : index
    %23 = vector.load %arg5[%c0_12, %c0_13] : memref<1x32xf32, #tpu.memory_space<vmem>>, vector<1x32xf32>
    %24 = vector.broadcast %23 : vector<1x32xf32> to vector<8x32xf32>
    %25 = arith.addf %22, %24 : vector<8x32xf32>
    %26 = arith.addf %25, %0 : vector<8x32xf32>
    %c0_14 = arith.constant 0 : index
    %c0_15 = arith.constant 0 : index
    %27 = vector.load %arg6[%c0_14, %c0_15] : memref<1x32xf32, #tpu.memory_space<vmem>>, vector<1x32xf32>
    %c0_16 = arith.constant 0 : index
    %c0_17 = arith.constant 0 : index
    %28 = vector.load %arg7[%c0_16, %c0_17] : memref<1x32xf32, #tpu.memory_space<vmem>>, vector<1x32xf32>
    %cst_18 = arith.constant dense<0.000000e+00> : vector<8xf32>
    %29 = vector.multi_reduction <add>, %26, %cst_18 [1] : vector<8x32xf32> to vector<8xf32>
    %30 = vector.shape_cast %29 : vector<8xf32> to vector<8x1xf32>
    %cst_19 = arith.constant 3.200000e+01 : f32
    %31 = vector.broadcast %cst_19 : f32 to vector<8x1xf32>
    %32 = arith.divf %30, %31 : vector<8x1xf32>
    %33 = vector.broadcast %32 : vector<8x1xf32> to vector<8x32xf32>
    %34 = arith.subf %26, %33 : vector<8x32xf32>
    %35 = arith.mulf %34, %34 : vector<8x32xf32>
    %cst_20 = arith.constant dense<0.000000e+00> : vector<8xf32>
    %36 = vector.multi_reduction <add>, %35, %cst_20 [1] : vector<8x32xf32> to vector<8xf32>
    %37 = vector.shape_cast %36 : vector<8xf32> to vector<8x1xf32>
    %cst_21 = arith.constant 3.200000e+01 : f32
    %38 = vector.broadcast %cst_21 : f32 to vector<8x1xf32>
    %39 = arith.divf %37, %38 : vector<8x1xf32>
    %cst_22 = arith.constant 9.99999996E-13 : f32
    %40 = vector.broadcast %cst_22 : f32 to vector<8x1xf32>
    %41 = arith.addf %39, %40 : vector<8x1xf32>
    %42 = math.rsqrt %41 : vector<8x1xf32>
    %43 = vector.broadcast %42 : vector<8x1xf32> to vector<8x32xf32>
    %44 = arith.mulf %34, %43 : vector<8x32xf32>
    %45 = vector.broadcast %27 : vector<1x32xf32> to vector<8x32xf32>
    %46 = arith.mulf %44, %45 : vector<8x32xf32>
    %47 = vector.broadcast %28 : vector<1x32xf32> to vector<8x32xf32>
    %48 = arith.addf %46, %47 : vector<8x32xf32>
    %c0_23 = arith.constant 0 : index
    %c0_24 = arith.constant 0 : index
    %49 = vector.load %arg8[%c0_23, %c0_24] : memref<8x32xf32, #tpu.memory_space<vmem>>, vector<8x32xf32>
    tpu.vector_store %arg8[%c0_23, %c0_24], %48 {strides = array<i32>} : memref<8x32xf32, #tpu.memory_space<vmem>>, vector<8x32xf32>,
    return
  }
  func.func @transform_0(%arg0: i32) -> (i32, i32) {
    %c0_i32 = arith.constant 0 : i32
    %c0_i32_0 = arith.constant 0 : i32
    return %arg0, %c0_i32 : i32, i32
  }
  func.func @transform_1(%arg0: i32) -> (i32, i32) {
    %c0_i32 = arith.constant 0 : i32
    %c0_i32_0 = arith.constant 0 : i32
    %c0_i32_1 = arith.constant 0 : i32
    return %c0_i32, %c0_i32_0 : i32, i32
  }
  func.func @transform_2(%arg0: i32) -> (i32, i32) {
    %c0_i32 = arith.constant 0 : i32
    %c0_i32_0 = arith.constant 0 : i32
    %c0_i32_1 = arith.constant 0 : i32
    return %c0_i32, %c0_i32_0 : i32, i32
  }
  func.func @transform_3(%arg0: i32) -> (i32, i32) {
    %c0_i32 = arith.constant 0 : i32
    %c0_i32_0 = arith.constant 0 : i32
    %c0_i32_1 = arith.constant 0 : i32
    return %c0_i32, %c0_i32_0 : i32, i32
  }
  func.func @transform_4(%arg0: i32) -> (i32, i32) {
    %c0_i32 = arith.constant 0 : i32
    %c0_i32_0 = arith.constant 0 : i32
    %c0_i32_1 = arith.constant 0 : i32
    return %c0_i32, %c0_i32_0 : i32, i32
  }
  func.func @transform_5(%arg0: i32) -> (i32, i32) {
    %c0_i32 = arith.constant 0 : i32
    %c0_i32_0 = arith.constant 0 : i32
    %c0_i32_1 = arith.constant 0 : i32
    return %c0_i32, %c0_i32_0 : i32, i32
  }
  func.func @transform_6(%arg0: i32) -> (i32, i32) {
    %c0_i32 = arith.constant 0 : i32
    %c0_i32_0 = arith.constant 0 : i32
    %c0_i32_1 = arith.constant 0 : i32
    return %c0_i32, %c0_i32_0 : i32, i32
  }
  func.func @transform_7(%arg0: i32) -> (i32, i32) {
    %c0_i32 = arith.constant 0 : i32
    %c0_i32_0 = arith.constant 0 : i32
    return %arg0, %c0_i32 : i32, i32
  }
}

</mosaic_0001>

<bundles_post_ra>
// kernel: span_encoder_forward.7
= control target key start
LH: loop header
LB: loop body
LE: loop exit
PB: predicated region body
PF: predicated region fallthrough
CT: control target
= control target key end

     0   :  { %s301_s12 = smov 0   ;;  %s327_s0 = inlined_call_operand.vmem [shape: f32[16,32], index: 0, kind: input, shape index: {}]   ;;  %s328_s1 = inlined_call_operand.vmem [shape: f32[1,32], index: 1, kind: input, shape index: {}]   ;;  %s329_s2 = inlined_call_operand.vmem [shape: f32[1,32], index: 2, kind: input, shape index: {}]   ;;  %s330_s3 = inlined_call_operand.vmem [shape: f32[16,32], index: 3, kind: output, shape index: {}]  }
   0x1 LB: > { %s252_s13 = sadd.s32 4294967295, %s279_s12   ;;  %p256_p0 = scmp.ge.s32.totalorder %s279_s12, 1  ;;  %s279_s12 = sphi %s301_s12, %s13_s12  }
   0x2   : > { %p136_p1 = scmp.lt.s32.totalorder %s279_s12, 3 }
   0x4   : > { %p137_p2 = pnand %p256_p0, %p136_p1 }
   0x5   : > { %p158_p3 = scmp.lt.s32.totalorder (!%p137_p2), %s252_s13, 1 }
   0x6   : > { %140 = sbr.rel (%p137_p2) target bundleno = 324 (0x144), region = 32 }
   0xb   : > { %s332_s13 = smov (!%p158_p3, %s252_s13), 1  ;;  %vm169_vm0 = vcmask 261120   ;;  %v259_v11 = vld [vmem:[%s328_s1] ss:$0 sm:$0xff] }
   0xc   : > { %s257_s14 = sshll.u32 %s332_s13, 3  ;;  %v260_v13 = vld [vmem:[%s329_s2] ss:$0 sm:$0xff] }
   0xd   : > { %s161_s17 = scalar_lea.vmem %s327_s0, %s257_s14  ;;  %s165_s24 = scalar_lea.vmem %s330_s3, %s257_s14 }
   0xe   : > { %v166_v0 = vld [vmem:[%s161_s17] sm:$0xff] }
   0xf   : > { %v170_v1 = vsel %vm169_vm0, %v166_v0, 0.0 }
  0x10   : > { %171 = vadd.xlane.f32.xlu0 %v170_v1 }
  0x99   : > { %v172_v2 = vpop.xlane.xlu0 %171 }
  0x9a   : > { %v174_v3 = vmul.f32 0.03125, %v172_v2 }
  0x9c   : > { %v175_v4 = vsub.f32 %v166_v0, %v174_v3 }
  0x9e   : > { %v176_v5 = vmul.f32 %v175_v4, %v175_v4 }
  0xa0   : > { %v177_v6 = vsel %vm169_vm0, %v176_v5, 0.0 }
  0xa1   : > { %178 = vadd.xlane.f32.xlu0 %v177_v6 }
 0x12a   : > { %v179_v7 = vpop.xlane.xlu0 %178 }
 0x12b   : > { %v180_v8 = vmul.f32 0.03125, %v179_v7 }
 0x12d   : > { %v181_v9 = vadd.f32 1e-12, %v180_v8 }
 0x12f   : > { %271 = vrsqrt.f32 %v181_v9 }
 0x13c   : > { %v272_v10 = vpop.eup %271 }
 0x13d   : > { %v183_v12 = vmul.f32 %v272_v10, %v175_v4 }
 0x13f   : > { %v190_v14 = vmul.f32 %v259_v11, %v183_v12 }
 0x141   : > { %v197_v15 = vadd.f32 %v260_v13, %v190_v14 }
 0x143   : > { %198 = vst.msk [vmem:[%s165_s24] sm:$0xff] %vm169_vm0, %v197_v15 }
 0x144 PF: > { %s13_s12 = sadd.s32 1, %s279_s12  }
 0x145   : > { %p10_p4 = scmp.ge.s32.totalorder %s13_s12, 4  }
 0x147   :  { %12 = sbr.rel (!%p10_p4) target bundleno = 1 (0x1), region = 62 }

// kernel: span_encoder_forward.8
= control target key start
LH: loop header
LB: loop body
LE: loop exit
PB: predicated region body
PF: predicated region fallthrough
CT: control target
= control target key end

     0   :  { %s358_s12 = smov 0   ;;  %s384_s0 = inlined_call_operand.vmem [shape: f32[16,32], index: 0, kind: input, shape index: {}]   ;;  %s385_s1 = inlined_call_operand.vmem [shape: bf16[32,96], index: 1, kind: input, shape index: {}]   ;;  %s386_s2 = inlined_call_operand.vmem [shape: f32[1,96], index: 2, kind: input, shape index: {}]   ;;  %s387_s3 = inlined_call_operand.vmem [shape: bf16[16,96], index: 3, kind: output, shape index: {}]  }
   0x1 LB: > { %s292_s13 = sadd.s32 4294967295, %s334_s12   ;;  %p296_p0 = scmp.ge.s32.totalorder %s334_s12, 1  ;;  %s334_s12 = sphi %s358_s12, %s13_s12  }
   0x2   : > { %p136_p1 = scmp.lt.s32.totalorder %s334_s12, 3 }
   0x4   : > { %p137_p2 = pnand %p296_p0, %p136_p1 }
   0x5   : > { %p158_p3 = scmp.lt.s32.totalorder (!%p137_p2), %s292_s13, 1 }
   0x6   : > { %140 = sbr.rel (%p137_p2) target bundleno = 219 (0xdb), region = 32 }
   0xb   : > { %v326_v0 = vld [vmem:[%s385_s1 + $0x8] sm:$0xff]   ;;  %v336_v1 = vmov 0.0   ;;  %v327_v2 = vld [vmem:[%s385_s1] sm:$0xff]   ;;  %vm337_vm0 = vmmov 0   ;;  %s389_s13 = smov (!%p158_p3, %s292_s13), 1  ;;  %vm192_vm1 = vcmask 261120  }
   0xc   : > { %308 = vmatprep.subr.bf16.mxu0 %v336_v1  ;;  %312 = vmatprep.mubr.msk.bf16.mxu0 %vm337_vm0, %v336_v1  ;;  %s297_s18 = sshll.u32 %s389_s13, 3  ;;  %v299_v5 = vld [vmem:[%s386_s2] ss:$0 sm:$0xff]  ;;  %s298_s24 = sshll.u32 %s389_s13, 2  ;;  %vm237_vm2 = vcmask 781312  }
   0xd   : > { %309 = vmatpush3.bf16.msra.mxu0 %v326_v0  ;;  %s161_s21 = scalar_lea.vmem %s384_s0, %s297_s18  ;;  %s165_s27 = scalar_lea.vmem %s387_s3, %s298_s24 }
   0xe   : > { %310 = vmatprep.subr.bf16.mxu0 %v336_v1  ;;  %v167_v3 = vld [vmem:[%s161_s21] sm:$0xff] }
   0xf   : > { %v172_v4 = vpack.c.bf16 %v167_v3, %v167_v3 }
  0x11   : > { %311 = vmatpush3.bf16.msra.mxu0 %v327_v2 }
  0x14   : > { %313 = vmatmul.mubr.msk.bf16.vlgmr.msra.gmra.mxu0 %vm192_vm1, %v172_v4 }
  0xd4   : > { %v230_v6 = vpop.f32.mrf.mxu0 }
  0xd5   : > { %v231_v7 = vadd.f32 %v299_v5, %v230_v6 }
  0xd6   : > { %v314_v8 = vpop.f32.mrf.mxu0 }
  0xd7   : > { %v236_v9 = vpack.c.bf16 %v231_v7, %v231_v7 }
  0xd8   : > { %v233_v10 = vpop.f32.mrf.mxu0 }
  0xd9   : > { %238 = vst.msk [vmem:[%s165_s27] sm:$0xf] %vm237_vm2, %v236_v9 }
  0xda   : > { %v315_v11 = vpop.f32.mrf.mxu0 }
  0xdb PF: > { %s13_s12 = sadd.s32 1, %s334_s12  }
  0xdc   : > { %p10_p4 = scmp.ge.s32.totalorder %s13_s12, 4  }
  0xde   :  { %12 = sbr.rel (!%p10_p4) target bundleno = 1 (0x1), region = 62 }

// kernel: span_encoder_forward.10
= control target key start
LH: loop header
LB: loop body
LE: loop exit
PB: predicated region body
PF: predicated region fallthrough
CT: control target
= control target key end

     0   :  { %s641_s24 = smov 0   ;;  %s699_s0 = inlined_call_operand.vmem [shape: f32[16,32], index: 0, kind: input, shape index: {}]   ;;  %s700_s1 = inlined_call_operand.vmem [shape: bf16[32,64], index: 1, kind: input, shape index: {}]   ;;  %s701_s2 = inlined_call_operand.vmem [shape: f32[1,64], index: 2, kind: input, shape index: {}]   ;;  %s702_s3 = inlined_call_operand.vmem [shape: bf16[64,32], index: 3, kind: input, shape index: {}]   ;;  %s703_s4 = inlined_call_operand.vmem [shape: f32[1,32], index: 4, kind: input, shape index: {}]   ;;  %s704_s5 = inlined_call_operand.vmem [shape: f32[1,32], index: 5, kind: input, shape index: {}]   ;;  %s705_s6 = inlined_call_operand.vmem [shape: f32[1,32], index: 6, kind: input, shape index: {}]   ;;  %s706_s7 = inlined_call_operand.vmem [shape: f32[16,32], index: 7, kind: output, shape index: {}]  }
   0x1 LB: > { %s522_s25 = sadd.s32 4294967295, %s597_s24   ;;  %p526_p0 = scmp.ge.s32.totalorder %s597_s24, 1  ;;  %s597_s24 = sphi %s641_s24, %s17_s24  }
   0x2   : > { %p236_p1 = scmp.lt.s32.totalorder %s597_s24, 3 }
   0x4   : > { %p237_p2 = pnand %p526_p0, %p236_p1 }
   0x5   : > { %p266_p3 = scmp.lt.s32.totalorder (!%p237_p2), %s522_s25, 1 }
   0x6   : > { %240 = sbr.rel (%p237_p2) target bundleno = 751 (0x2ef), region = 48 }
   0xb   : > { %v581_v0 = vld [vmem:[%s700_s1 + $0x8] sm:$0xff]   ;;  %v599_v1 = vmov 0.0   ;;  %v582_v2 = vld [vmem:[%s700_s1] sm:$0xff]   ;;  %vm600_vm0 = vmmov 0   ;;  %s708_s25 = smov (!%p266_p3, %s522_s25), 1  ;;  %vm300_vm1 = vcmask 261120  }
   0xc   : > { %551 = vmatprep.subr.bf16.mxu0 %v599_v1  ;;  %559 = vmatprep.subr.bf16.mxu1 %v599_v1  ;;  %s527_s30 = sshll.u32 %s708_s25, 3  ;;  %v583_v5 = vld [vmem:[%s702_s3 + $0x18] sm:$0xff]   ;;  %v584_v6 = vld [vmem:[%s702_s3 + $0x10] sm:$0xff]   ;;  %v585_v7 = vld [vmem:[%s702_s3 + $0x8] sm:$0xff]   ;;  %vm393_vm2 = vcmask 523264  }
   0xd   : > { %552 = vmatpush3.bf16.msra.mxu0 %v581_v0  ;;  %555 = vmatprep.mubr.msk.bf16.mxu0 %vm600_vm0, %v599_v1  ;;  %s269_s10 = scalar_lea.vmem %s699_s0, %s527_s30  ;;  %v586_v8 = vld [vmem:[%s702_s3] sm:$0xff]   ;;  %s273_s9 = scalar_lea.vmem %s706_s7, %s527_s30 }
   0xe   : > { %553 = vmatprep.subr.bf16.mxu0 %v599_v1  ;;  %567 = vmatprep.mubr.msk.bf16.mxu1 %vm600_vm0, %v599_v1  ;;  %v275_v3 = vld [vmem:[%s269_s10] sm:$0xff] }
   0xf   : > { %v280_v4 = vpack.c.bf16 %v275_v3, %v275_v3  ;;  %560 = vmatpush3.bf16.msra.mxu1 %v583_v5  ;;  %v529_v9 = vld [vmem:[%s701_s2] ss:$0 sm:$0xff] }
  0x10   : > { %561 = vmatprep.subr.bf16.mxu1 %v599_v1  ;;  %v533_v25 = vld [vmem:[%s703_s4] ss:$0 sm:$0xff] }
  0x11   : > { %554 = vmatpush3.bf16.msra.mxu0 %v582_v2  ;;  %v539_v42 = vld [vmem:[%s704_s5] ss:$0 sm:$0xff] }
  0x12   : > { %v540_v44 = vld [vmem:[%s705_s6] ss:$0 sm:$0xff] }
  0x13   : > { %562 = vmatpush3.bf16.msra.mxu1 %v584_v6 }
  0x14   : > { %556 = vmatmul.mubr.msk.bf16.vlgmr.msra.gmra.mxu0 %vm300_vm1, %v280_v4  ;;  %563 = vmatprep.subr.bf16.mxu1 %v599_v1 }
  0x17   : > { %564 = vmatpush3.bf16.msra.mxu1 %v585_v7 }
  0x18   : > { %565 = vmatprep.subr.bf16.mxu1 %v599_v1 }
  0x1b   : > { %566 = vmatpush3.bf16.msra.mxu1 %v586_v8 }
  0xd4   : > { %v338_v10 = vpop.f32.mrf.mxu0 }
  0xd5   : > { %v339_v11 = vadd.f32 %v529_v9, %v338_v10 }
  0xd6   : > { %v557_v12 = vpop.f32.mrf.mxu0 }
  0xd7   : > { %v345_v13 = vmul.f32 0.044715, %v339_v11  ;;  %v344_v21 = vmul.f32 0.5, %v339_v11 }
  0xd8   : > { %v341_v14 = vpop.f32.mrf.mxu0 }
  0xd9   : > { %v346_v15 = vmul.f32 %v345_v13, %v339_v11 }
  0xda   : > { %v558_v16 = vpop.f32.mrf.mxu0 }
  0xdb   : > { %v347_v17 = vmul.f32 %v346_v15, %v339_v11 }
  0xdd   : > { %v348_v18 = vadd.f32 %v347_v17, %v339_v11 }
  0xdf   : > { %v349_v19 = vmul.f32 0.7978846, %v348_v18 }
  0xe1   : > { %587 = vtanh.f32 %v349_v19 }
  0xee   : > { %v588_v20 = vpop.eup %587 }
  0xef   : > { %v351_v22 = vadd.f32 1.0, %v588_v20 }
  0xf1   : > { %v352_v23 = vmul.f32 %v351_v22, %v344_v21 }
  0xf3   : > { %v353_v24 = vpack.c.bf16 %v352_v23, %v352_v23 }
  0xf5   : > { %568 = vmatmul.mubr.msk.bf16.vlgmr.msra.gmra.mxu1 %vm393_vm2, %v353_v24 }
 0x1b5   : > { %v431_v26 = vpop.f32.mrf.mxu1 }
 0x1b6   : > { %v432_v27 = vadd.f32 %v533_v25, %v431_v26 }
 0x1b7   : > { %v569_v28 = vpop.f32.mrf.mxu1 }
 0x1b8   : > { %v437_v29 = vadd.f32 %v432_v27, %v275_v3 }
 0x1b9   : > { %v434_v30 = vpop.f32.mrf.mxu1 }
 0x1ba   : > { %v440_v31 = vsel %vm300_vm1, %v437_v29, 0.0 }
 0x1bb   : > { %441 = vadd.xlane.f32.xlu0 %v440_v31  ;;  %v570_v32 = vpop.f32.mrf.mxu1 }
 0x244   : > { %v442_v33 = vpop.xlane.xlu0 %441 }
 0x245   : > { %v444_v34 = vmul.f32 0.03125, %v442_v33 }
 0x247   : > { %v445_v35 = vsub.f32 %v437_v29, %v444_v34 }
 0x249   : > { %v446_v36 = vmul.f32 %v445_v35, %v445_v35 }
 0x24b   : > { %v447_v37 = vsel %vm300_vm1, %v446_v36, 0.0 }
 0x24c   : > { %448 = vadd.xlane.f32.xlu0 %v447_v37 }
 0x2d5   : > { %v449_v38 = vpop.xlane.xlu0 %448 }
 0x2d6   : > { %v450_v39 = vmul.f32 0.03125, %v449_v38 }
 0x2d8   : > { %v451_v40 = vadd.f32 1e-12, %v450_v39 }
 0x2da   : > { %589 = vrsqrt.f32 %v451_v40 }
 0x2e7   : > { %v590_v41 = vpop.eup %589 }
 0x2e8   : > { %v453_v43 = vmul.f32 %v590_v41, %v445_v35 }
 0x2ea   : > { %v460_v45 = vmul.f32 %v539_v42, %v453_v43 }
 0x2ec   : > { %v467_v46 = vadd.f32 %v540_v44, %v460_v45 }
 0x2ee   : > { %468 = vst.msk [vmem:[%s273_s9] sm:$0xff] %vm300_vm1, %v467_v46 }
 0x2ef PF: > { %s17_s24 = sadd.s32 1, %s597_s24  }
 0x2f0   : > { %p14_p4 = scmp.ge.s32.totalorder %s17_s24, 4  }
 0x2f2   :  { %16 = sbr.rel (!%p14_p4) target bundleno = 1 (0x1), region = 78 }

// kernel: span_encoder_forward.9
= control target key start
LH: loop header
LB: loop body
LE: loop exit
PB: predicated region body
PF: predicated region fallthrough
CT: control target
= control target key end

     0   :  { %s1206_s21 = smov 0   ;;  %s1340_s0 = inlined_call_operand.vmem [shape: bf16[2,12,8,8], index: 0, kind: input, shape index: {}]   ;;  %s1341_s1 = inlined_call_operand.vmem [shape: f32[2,8,32], index: 1, kind: input, shape index: {}]   ;;  %s1342_s2 = inlined_call_operand.vmem [shape: bf16[4,8,32], index: 2, kind: input, shape index: {}]   ;;  %s1343_s3 = inlined_call_operand.vmem [shape: f32[1,32], index: 3, kind: input, shape index: {}]   ;;  %s1344_s4 = inlined_call_operand.vmem [shape: f32[1,32], index: 4, kind: input, shape index: {}]   ;;  %s1345_s5 = inlined_call_operand.vmem [shape: f32[1,32], index: 5, kind: input, shape index: {}]   ;;  %s1346_s6 = inlined_call_operand.vmem [shape: f32[2,8,32], index: 6, kind: output, shape index: {}]  }
   0x1 LB: > { %s1008_s22 = sadd.s32 4294967295, %s1167_s21   ;;  %p1012_p0 = scmp.ge.s32.totalorder %s1167_s21, 1  ;;  %s1167_s21 = sphi %s1206_s21, %s16_s21  }
   0x2   : > { %p221_p1 = scmp.lt.s32.totalorder %s1167_s21, 3 }
   0x4   : > { %p222_p2 = pnand %p1012_p0, %p221_p1 }
   0x5   : > { %p254_p3 = scmp.lt.s32.totalorder (!%p222_p2), %s1008_s22, 1 }
   0x6   : > { %225 = sbr.rel (%p222_p2) target bundleno = 1242 (0x4da), region = 44 }
   0xb   : > { %v1169_v0 = vmov 0.0   ;;  %s1348_s22 = smov (!%p254_p3, %s1008_s22), 1  ;;  %vm1170_vm0 = vmmov 0   ;;  %vm285_vm1 = vcmask 64512   ;;  %vm521_vm2 = vcmask 1043456  }
   0xc   : > { %1060 = vmatprep.subr.bf16.mxu0 %v1169_v0  ;;  %1066 = vmatprep.subr.bf16.mxu1 %v1169_v0  ;;  %s1132_s23 = smul.u32 48, %s1348_s22  ;;  %s1014_s11 = sshll.u32 %s1348_s22, 3  ;;  %vm913_vm3 = vcmask 261120  }
   0xd   : > { %1062 = vmatprep.mubr.msk.bf16.mxu0 %vm1170_vm0, %v1169_v0  ;;  %1068 = vmatprep.mubr.msk.bf16.mxu1 %vm1170_vm0, %v1169_v0  ;;  %s262_s14 = scalar_lea.vmem %s1341_s1, %s1014_s11  ;;  %s266_s25 = scalar_lea.vmem %s1346_s6, %s1014_s11 }
   0xe   : > { %s1226_s26 = scalar_lea.vmem %s1340_s0, %s1132_s23 }
   0xf   : > { %v273_v1 = vld [vmem:[%s1226_s26 + $0x10] sm:$0xf]  ;;  %v274_v2 = vld [vmem:[%s1226_s26 + $0x14] sm:$0xf]  ;;  %v269_v5 = vld [vmem:[%s1226_s26] sm:$0xf] }
  0x10   : > { %v290_v3 = vsel %vm285_vm1, %v273_v1, 0  ;;  %v336_v4 = vsel %vm285_vm1, %v274_v2, 0  ;;  %v270_v6 = vld [vmem:[%s1226_s26 + $0x4] sm:$0xf]  ;;  %v275_v7 = vld [vmem:[%s1226_s26 + $0x18] sm:$0xf] }
  0x11   : > { %1061 = vmatpush3.bf16.xpose.msra.mxu0 %v290_v3  ;;  %1067 = vmatpush3.bf16.xpose.msra.mxu1 %v336_v4  ;;  %v276_v8 = vld [vmem:[%s1226_s26 + $0x1c] sm:$0xf]  ;;  %v281_v9 = vmul.bf16 1052065461, %v269_v5  ;;  %v282_v10 = vmul.bf16 1052065461, %v270_v6 }
  0x12   : > { %1072 = vmatprep.subr.bf16.mxu0 %v1169_v0  ;;  %1078 = vmatprep.subr.bf16.mxu1 %v1169_v0  ;;  %v382_v11 = vsel %vm285_vm1, %v275_v7, 0  ;;  %v428_v12 = vsel %vm285_vm1, %v276_v8, 0  ;;  %v271_v13 = vld [vmem:[%s1226_s26 + $0x8] sm:$0xf]  ;;  %v272_v14 = vld [vmem:[%s1226_s26 + $0xc] sm:$0xf] }
  0x13   : > { %v283_v15 = vmul.bf16 1052065461, %v271_v13  ;;  %v284_v16 = vmul.bf16 1052065461, %v272_v14  ;;  %v277_v57 = vld [vmem:[%s1226_s26 + $0x20] sm:$0xf] }
  0x14   : > { %v278_v58 = vld [vmem:[%s1226_s26 + $0x24] sm:$0xf]  ;;  %v523_v59 = vsel %vm521_vm2, %v277_v57, 0  ;;  %v279_v3 = vld [vmem:[%s1226_s26 + $0x28] sm:$0xf] }
  0x15   : > { %v569_v60 = vsel %vm521_vm2, %v278_v58, 0  ;;  %v615_v6 = vsel %vm521_vm2, %v279_v3, 0  ;;  %v280_v8 = vld [vmem:[%s1226_s26 + $0x2c] sm:$0xf]  ;;  %v713_v13 = vld [vmem:[%s1342_s2] sm:$0xf] }
  0x18   : > { %1063 = vmatmul.mubr.msk.bf16.vlgmr.msra.gmra.mxu0 %vm285_vm1, %v281_v9  ;;  %1069 = vmatmul.mubr.msk.bf16.vlgmr.msra.gmra.mxu1 %vm285_vm1, %v282_v10 }
  0x19   : > { %1073 = vmatpush3.bf16.xpose.msra.mxu0 %v382_v11  ;;  %1079 = vmatpush3.bf16.xpose.msra.mxu1 %v428_v12  ;;  %v661_v11 = vsel %vm521_vm2, %v280_v8, 0 }
  0x1a   : > { %1074 = vmatprep.mubr.msk.bf16.mxu0 %vm1170_vm0, %v1169_v0  ;;  %1080 = vmatprep.mubr.msk.bf16.mxu1 %vm1170_vm0, %v1169_v0 }
  0x1b   : > { %1084 = vmatprep.subr.bf16.mxu0 %v1169_v0  ;;  %1090 = vmatprep.subr.bf16.mxu1 %v1169_v0 }
  0x20   : > { %1075 = vmatmul.mubr.msk.bf16.vlgmr.msra.gmra.mxu0 %vm285_vm1, %v283_v15  ;;  %1081 = vmatmul.mubr.msk.bf16.vlgmr.msra.gmra.mxu1 %vm285_vm1, %v284_v16  ;;  %v718_v16 = vsel %vm521_vm2, %v713_v13, 0 }
  0x21   : > { %1086 = vmatprep.mubr.msk.bf16.mxu0 %vm1170_vm0, %v1169_v0  ;;  %1092 = vmatprep.mubr.msk.bf16.mxu1 %vm1170_vm0, %v1169_v0 }
  0x22   : > { %1085 = vmatpush3.bf16.msra.mxu0 %v523_v59  ;;  %1091 = vmatpush3.bf16.msra.mxu1 %v569_v60 }
  0x23   : > { %1096 = vmatprep.subr.bf16.mxu0 %v1169_v0  ;;  %1102 = vmatprep.subr.bf16.mxu1 %v1169_v0 }
  0xd8   : > { %v326_v17 = vpop.f32.mrf.mxu0  ;;  %v372_v18 = vpop.f32.mrf.mxu1 }
  0xd9   : > { %v470_v19 = vsel %vm285_vm1, %v326_v17, -inf  ;;  %v473_v22 = vsel %vm285_vm1, %v372_v18, -inf }
  0xda   : > { %v1070_v20 = vpop.f32.mrf.mxu1  ;;  %471 = vmax.xlane.f32.xlu0 %v470_v19  ;;  %v1064_v21 = vpop.f32.mrf.mxu0 }
  0xdb   : > { %v1026_v20 = vld [vmem:[%s1342_s2 + $0x4] sm:$0xf] }
  0xdc   : > { %v329_v23 = vpop.f32.mrf.mxu0  ;;  %v375_v24 = vpop.f32.mrf.mxu1  ;;  %v768_v21 = vsel %vm521_vm2, %v1026_v20, 0 }
  0xde   : > { %v1071_v25 = vpop.f32.mrf.mxu1  ;;  %474 = vmax.xlane.f32.xlu0 %v473_v22  ;;  %v1065_v26 = vpop.f32.mrf.mxu0  ;;  %v1028_v22 = vld [vmem:[%s1342_s2 + $0x8] sm:$0xf] }
  0xdf   : > { %v818_v25 = vsel %vm521_vm2, %v1028_v22, 0 }
  0xe0   : > { %v418_v27 = vpop.f32.mrf.mxu0  ;;  %v464_v28 = vpop.f32.mrf.mxu1 }
  0xe1   : > { %v476_v29 = vsel %vm285_vm1, %v418_v27, -inf  ;;  %v479_v32 = vsel %vm285_vm1, %v464_v28, -inf }
  0xe2   : > { %v1082_v30 = vpop.f32.mrf.mxu1  ;;  %477 = vmax.xlane.f32.xlu1 %v476_v29  ;;  %v1076_v31 = vpop.f32.mrf.mxu0 }
  0xe4   : > { %v421_v33 = vpop.f32.mrf.mxu0  ;;  %v467_v34 = vpop.f32.mrf.mxu1 }
  0xe6   : > { %v1083_v35 = vpop.f32.mrf.mxu1  ;;  %480 = vmax.xlane.f32.xlu1 %v479_v32  ;;  %v1077_v36 = vpop.f32.mrf.mxu0 }
 0x163   : > { %v472_v37 = vpop.xlane.xlu0 %471 }
 0x164   : > { %v482_v38 = vsub.f32 %v326_v17, %v472_v37 }
 0x166   : > { %v486_v39 = vmul.f32 1.442695, %v482_v38 }
 0x167   : > { %v475_v40 = vpop.xlane.xlu0 %474 }
 0x168   : > { %1143 = vpow2.f32 %v486_v39  ;;  %v483_v41 = vsub.f32 %v372_v18, %v475_v40 }
 0x16a   : > { %v488_v42 = vmul.f32 1.442695, %v483_v41 }
 0x16b   : > { %v478_v43 = vpop.xlane.xlu1 %477 }
 0x16c   : > { %1145 = vpow2.f32 %v488_v42  ;;  %v484_v44 = vsub.f32 %v418_v27, %v478_v43  ;;  %v1030_v27 = vld [vmem:[%s1342_s2 + $0xc] sm:$0xf] }
 0x16d   : > { %v868_v31 = vsel %vm521_vm2, %v1030_v27, 0 }
 0x16e   : > { %v490_v45 = vmul.f32 1.442695, %v484_v44 }
 0x16f   : > { %v481_v46 = vpop.xlane.xlu1 %480 }
 0x170   : > { %1147 = vpow2.f32 %v490_v45  ;;  %v485_v47 = vsub.f32 %v464_v28, %v481_v46  ;;  %v1024_v46 = vld [vmem:[%s1343_s3] ss:$0 sm:$0xff] }
 0x172   : > { %v492_v48 = vmul.f32 1.442695, %v485_v47 }
 0x174   : > { %1149 = vpow2.f32 %v492_v48 }
 0x175   : > { %v1144_v49 = vpop.eup %1143 }
 0x176   : > { %v494_v50 = vsel %vm285_vm1, %v1144_v49, 0.0 }
 0x177   : > { %495 = vadd.xlane.f32.xlu0 %v494_v50 }
 0x179   : > { %v1146_v51 = vpop.eup %1145 }
 0x17a   : > { %v497_v52 = vsel %vm285_vm1, %v1146_v51, 0.0 }
 0x17b   : > { %498 = vadd.xlane.f32.xlu1 %v497_v52 }
 0x17d   : > { %v1148_v53 = vpop.eup %1147 }
 0x17e   : > { %v500_v54 = vsel %vm285_vm1, %v1148_v53, 0.0 }
 0x17f   : > { %501 = vadd.xlane.f32.xlu0 %v500_v54 }
 0x181   : > { %v1150_v55 = vpop.eup %1149 }
 0x182   : > { %v503_v56 = vsel %vm285_vm1, %v1150_v55, 0.0 }
 0x183   : > { %504 = vadd.xlane.f32.xlu1 %v503_v56 }
 0x200   : > { %v496_v61 = vpop.xlane.xlu0 %495 }
 0x201   : > { %1151 = vrcp.f32 %v496_v61 }
 0x204   : > { %v499_v62 = vpop.xlane.xlu1 %498 }
 0x205   : > { %1153 = vrcp.f32 %v499_v62 }
 0x208   : > { %v502_v63 = vpop.xlane.xlu0 %501 }
 0x209   : > { %1155 = vrcp.f32 %v502_v63 }
 0x20c   : > { %v505_v1 = vpop.xlane.xlu1 %504 }
 0x20d   : > { %1157 = vrcp.f32 %v505_v1 }
 0x20e   : > { %v1152_v2 = vpop.eup %1151 }
 0x20f   : > { %v510_v4 = vmul.f32 %v1152_v2, %v1144_v49 }
 0x211   : > { %v514_v5 = vpack.c.bf16 %v510_v4, %v510_v4 }
 0x212   : > { %v1154_v7 = vpop.eup %1153 }
 0x213   : > { %1087 = vmatmul.mubr.msk.bf16.vlgmr.msra.gmra.mxu0 %vm285_vm1, %v514_v5  ;;  %v511_v9 = vmul.f32 %v1154_v7, %v1146_v51 }
 0x214   : > { %1097 = vmatpush3.bf16.msra.mxu0 %v615_v6  ;;  %1098 = vmatprep.mubr.msk.bf16.mxu0 %vm1170_vm0, %v1169_v0 }
 0x215   : > { %v515_v10 = vpack.c.bf16 %v511_v9, %v511_v9  ;;  %1108 = vmatprep.subr.bf16.mxu0 %v1169_v0 }
 0x216   : > { %v1156_v12 = vpop.eup %1155 }
 0x217   : > { %1093 = vmatmul.mubr.msk.bf16.vlgmr.msra.gmra.mxu1 %vm285_vm1, %v515_v10  ;;  %v512_v14 = vmul.f32 %v1156_v12, %v1148_v53 }
 0x218   : > { %1103 = vmatpush3.bf16.msra.mxu1 %v661_v11  ;;  %1104 = vmatprep.mubr.msk.bf16.mxu1 %vm1170_vm0, %v1169_v0 }
 0x219   : > { %v516_v15 = vpack.c.bf16 %v512_v14, %v512_v14  ;;  %1114 = vmatprep.subr.bf16.mxu1 %v1169_v0 }
 0x21a   : > { %v1158_v17 = vpop.eup %1157 }
 0x21b   : > { %1099 = vmatmul.mubr.msk.bf16.vlgmr.msra.gmra.mxu0 %vm285_vm1, %v516_v15  ;;  %v513_v18 = vmul.f32 %v1158_v17, %v1150_v55  ;;  %v1032_v15 = vld [vmem:[%s1344_s4] ss:$0 sm:$0xff] }
 0x21c   : > { %1109 = vmatpush3.bf16.msra.mxu0 %v718_v16  ;;  %1110 = vmatprep.mubr.msk.bf16.mxu0 %vm1170_vm0, %v1169_v0  ;;  %v1033_v17 = vld [vmem:[%s1345_s5] ss:$0 sm:$0xff] }
 0x21d   : > { %v517_v19 = vpack.c.bf16 %v513_v18, %v513_v18  ;;  %1120 = vmatprep.subr.bf16.mxu0 %v1169_v0 }
 0x21f   : > { %1105 = vmatmul.mubr.msk.bf16.vlgmr.msra.gmra.mxu1 %vm285_vm1, %v517_v19 }
 0x220   : > { %1116 = vmatprep.mubr.msk.bf16.mxu1 %vm1170_vm0, %v1169_v0  ;;  %1115 = vmatpush3.bf16.msra.mxu1 %v768_v21 }
 0x221   : > { %1126 = vmatprep.subr.bf16.mxu1 %v1169_v0 }
 0x2d3   : > { %v559_v23 = vpop.f32.mrf.mxu0 }
 0x2d4   : > { %v712_v24 = vpack.c.bf16 %v559_v23, %v559_v23 }
 0x2d5   : > { %v1088_v26 = vpop.f32.mrf.mxu0 }
 0x2d6   : > { %1111 = vmatmul.mubr.msk.bf16.vlgmr.msra.gmra.mxu0 %vm285_vm1, %v712_v24 }
 0x2d7   : > { %v562_v28 = vpop.f32.mrf.mxu0  ;;  %v605_v29 = vpop.f32.mrf.mxu1  ;;  %1121 = vmatpush3.bf16.msra.mxu0 %v818_v25  ;;  %1122 = vmatprep.mubr.msk.bf16.mxu0 %vm1170_vm0, %v1169_v0 }
 0x2d8   : > { %v761_v30 = vpack.c.bf16 %v605_v29, %v605_v29 }
 0x2d9   : > { %v1089_v32 = vpop.f32.mrf.mxu0  ;;  %v1094_v33 = vpop.f32.mrf.mxu1 }
 0x2da   : > { %1117 = vmatmul.mubr.msk.bf16.vlgmr.msra.gmra.mxu1 %vm285_vm1, %v761_v30 }
 0x2db   : > { %v608_v34 = vpop.f32.mrf.mxu1  ;;  %v651_v35 = vpop.f32.mrf.mxu0  ;;  %1127 = vmatpush3.bf16.msra.mxu1 %v868_v31  ;;  %1128 = vmatprep.mubr.msk.bf16.mxu1 %vm1170_vm0, %v1169_v0  ;;  %v703_v0 = vld [vmem:[%s262_s14] sm:$0xff] }
 0x2dc   : > { %v811_v36 = vpack.c.bf16 %v651_v35, %v651_v35  ;;  %v711_v49 = vadd.f32 %v1024_v46, %v703_v0 }
 0x2dd   : > { %v1095_v37 = vpop.f32.mrf.mxu1  ;;  %v1100_v38 = vpop.f32.mrf.mxu0 }
 0x2de   : > { %1123 = vmatmul.mubr.msk.bf16.vlgmr.msra.gmra.mxu0 %vm285_vm1, %v811_v36 }
 0x2df   : > { %v654_v39 = vpop.f32.mrf.mxu0  ;;  %v697_v40 = vpop.f32.mrf.mxu1 }
 0x2e0   : > { %v861_v41 = vpack.c.bf16 %v697_v40, %v697_v40 }
 0x2e1   : > { %v1101_v42 = vpop.f32.mrf.mxu0  ;;  %v1106_v43 = vpop.f32.mrf.mxu1 }
 0x2e2   : > { %1129 = vmatmul.mubr.msk.bf16.vlgmr.msra.gmra.mxu1 %vm285_vm1, %v861_v41 }
 0x2e3   : > { %v700_v44 = vpop.f32.mrf.mxu1 }
 0x2e5   : > { %v1107_v45 = vpop.f32.mrf.mxu1 }
 0x396   : > { %v754_v47 = vpop.f32.mrf.mxu0 }
 0x397   : > { %v760_v54 = vadd.f32 %v754_v47, %v711_v49 }
 0x398   : > { %v1112_v48 = vpop.f32.mrf.mxu0 }
 0x39a   : > { %v757_v50 = vpop.f32.mrf.mxu0  ;;  %v804_v51 = vpop.f32.mrf.mxu1 }
 0x39b   : > { %v810_v57 = vadd.f32 %v804_v51, %v760_v54 }
 0x39c   : > { %v1113_v52 = vpop.f32.mrf.mxu0  ;;  %v1118_v53 = vpop.f32.mrf.mxu1 }
 0x39e   : > { %v807_v55 = vpop.f32.mrf.mxu1  ;;  %v854_v56 = vpop.f32.mrf.mxu0 }
 0x39f   : > { %v860_v60 = vadd.f32 %v854_v56, %v810_v57 }
 0x3a0   : > { %v1119_v58 = vpop.f32.mrf.mxu1  ;;  %v1124_v59 = vpop.f32.mrf.mxu0 }
 0x3a2   : > { %v857_v61 = vpop.f32.mrf.mxu0  ;;  %v904_v62 = vpop.f32.mrf.mxu1 }
 0x3a3   : > { %v910_v63 = vadd.f32 %v904_v62, %v860_v60 }
 0x3a4   : > { %v1125_v1 = vpop.f32.mrf.mxu0  ;;  %v1130_v2 = vpop.f32.mrf.mxu1 }
 0x3a5   : > { %v914_v3 = vsel %vm913_vm3, %v910_v63, 0.0 }
 0x3a6   : > { %v907_v4 = vpop.f32.mrf.mxu1  ;;  %915 = vadd.xlane.f32.xlu0 %v914_v3 }
 0x3a8   : > { %v1131_v5 = vpop.f32.mrf.mxu1 }
 0x42f   : > { %v916_v6 = vpop.xlane.xlu0 %915 }
 0x430   : > { %v918_v7 = vmul.f32 0.03125, %v916_v6 }
 0x432   : > { %v919_v8 = vsub.f32 %v910_v63, %v918_v7 }
 0x434   : > { %v920_v9 = vmul.f32 %v919_v8, %v919_v8 }
 0x436   : > { %v921_v10 = vsel %vm913_vm3, %v920_v9, 0.0 }
 0x437   : > { %922 = vadd.xlane.f32.xlu1 %v921_v10 }
 0x4c0   : > { %v923_v11 = vpop.xlane.xlu1 %922 }
 0x4c1   : > { %v924_v12 = vmul.f32 0.03125, %v923_v11 }
 0x4c3   : > { %v925_v13 = vadd.f32 1e-12, %v924_v12 }
 0x4c5   : > { %1159 = vrsqrt.f32 %v925_v13 }
 0x4d2   : > { %v1160_v14 = vpop.eup %1159 }
 0x4d3   : > { %v927_v16 = vmul.f32 %v1160_v14, %v919_v8 }
 0x4d5   : > { %v934_v18 = vmul.f32 %v1032_v15, %v927_v16 }
 0x4d7   : > { %v941_v19 = vadd.f32 %v1033_v17, %v934_v18 }
 0x4d9   : > { %942 = vst.msk [vmem:[%s266_s25] sm:$0xff] %vm913_vm3, %v941_v19 }
 0x4da PF: > { %s16_s21 = sadd.s32 1, %s1167_s21  }
 0x4db   : > { %p13_p4 = scmp.ge.s32.totalorder %s16_s21, 4  }
 0x4dd   :  { %15 = sbr.rel (!%p13_p4) target bundleno = 1 (0x1), region = 80 }

// kernel: span_encoder_forward.13
= control target key start
LH: loop header
LB: loop body
LE: loop exit
PB: predicated region body
PF: predicated region fallthrough
CT: control target
= control target key end

     0   :  { %12 = vsyncpa [#allocation3], 0  ;;  %s869_s0 = inlined_call_operand.vmem [shape: f32[16,32], index: 0, kind: input, shape index: {}]   ;;  %s870_s1 = inlined_call_operand.vmem [shape: bf16[32,64], index: 1, kind: input, shape index: {}]   ;;  %s871_s2 = inlined_call_operand.vmem [shape: f32[1,64], index: 2, kind: input, shape index: {}]   ;;  %s872_s3 = inlined_call_operand.vmem [shape: bf16[64,32], index: 3, kind: input, shape index: {}]   ;;  %s873_s4 = inlined_call_operand.vmem [shape: f32[1,32], index: 4, kind: input, shape index: {}]   ;;  %s874_s5 = inlined_call_operand.vmem [shape: f32[1,32], index: 5, kind: input, shape index: {}]   ;;  %s875_s6 = inlined_call_operand.vmem [shape: f32[1,32], index: 6, kind: input, shape index: {}]   ;;  %s876_s7 = inlined_call_operand.hbm [shape: f32[16,32], index: 7, kind: output, shape index: {}]  }
   0x1   :  { %14 = vsyncpa [#allocation3 + $0x1], 0  ;;  %s748_s24 = smov 0   ;;  %s750_s25 = smov 0  }
   0x2   :  { %s752_s26 = smov 0   ;;  %s754_s27 = smov 0  }
   0x3 LB: > { %s769_s28 = sadd.s32 4294967295, %s703_s27   ;;  %s542_s29 = sadd.s32 4294967294, %s703_s27   ;;  %s703_s27 = sphi %s754_s27, %s882_s27   ;;  %s699_s26 = sphi %s752_s26, %s881_s26   ;;  %s695_s25 = sphi %s750_s25, %s880_s25   ;;  %s691_s24 = sphi %s748_s24, %s879_s24  }
   0x4   : > { %s773_s30 = sadd.s32 1, %s703_s27   ;;  %s179_s8 = sadd.s32 1, %s699_s26 }
   0x5   : > { %s176_s9 = ssub.s32 %s703_s27, %s773_s30  ;;  %p189_p0 = scmp.ne.s32.totalorder %s699_s26, %s695_s25 }
   0x6   : > { %p177_p1 = scmp.eq.s32.totalorder %s176_s9, 0  ;;  %p190_p2 = scmp.eq.s32.totalorder %s769_s28, 1 }
   0x7   : > { %p195_p3 = scmp.ne.s32.totalorder %s695_s25, %s691_s24  ;;  %p196_p4 = scmp.eq.s32.totalorder %s542_s29, 1 }
   0x8   : > { %s784_s10 = scalar_select %p177_p1, %s699_s26, %s179_s8  }
   0x9   : > { %p786_p5 = por %p190_p2, %p189_p0  ;;  %p790_p6 = por %p196_p4, %p195_p3 }
   0xa   : > { %p545_p7 = scmp.ge.s32.totalorder %s703_s27, 1  ;;  %p239_p8 = scmp.lt.s32.totalorder %s703_s27, 3 }
   0xc   : > { %p240_p9 = pnand %p545_p7, %p239_p8 }
   0xd   : > { %p270_p10 = scmp.lt.s32.totalorder (!%p240_p9), %s769_s28, 1  ;;  %s267_s20 = sand.u32 (!%p240_p9), 1, %s695_s25  }
   0xe   : > { %243 = sbr.rel (%p240_p9) target bundleno = 771 (0x303), region = 48  ;;  %s561_s9 = sshll.u32 (!%p240_p9), %s769_s28, 7 }
   0xf   : > { %s707_s22 = smov (!%p240_p9), [#allocation2]  }
  0x10   : > { %s647_s23 = sshll.u32 (!%p240_p9), %s707_s22, 4  ;;  %s648_s23 = int_to_ptr.vmem [resolvable:$false] %s647_s23 }
  0x13   : > { %v633_v0 = vld [vmem:[%s870_s1 + $0x8] sm:$0xff]   ;;  %v705_v1 = vmov 0.0   ;;  %v634_v2 = vld [vmem:[%s870_s1] sm:$0xff]   ;;  %vm706_vm0 = vmmov 0   ;;  %s271_s17 = scalar_select %p270_p10, %s769_s28, 1  ;;  %vm300_vm1 = vcmask 261120  }
  0x14   : > { %572 = vmatprep.subr.bf16.mxu0 %v705_v1  ;;  %580 = vmatprep.subr.bf16.mxu1 %v705_v1  ;;  %v635_v5 = vld [vmem:[%s872_s3 + $0x18] sm:$0xff]   ;;  %v636_v6 = vld [vmem:[%s872_s3 + $0x10] sm:$0xff]   ;;  %v637_v7 = vld [vmem:[%s872_s3 + $0x8] sm:$0xff]   ;;  %vm393_vm2 = vcmask 523264   ;;  %s649_s28 = scalar_lea.vmem %s648_s23, 256 }
  0x15   : > { %573 = vmatpush3.bf16.msra.mxu0 %v633_v0  ;;  %576 = vmatprep.mubr.msk.bf16.mxu0 %vm706_vm0, %v705_v1  ;;  %s547_s18 = sshll.u32 %s271_s17, 3  ;;  %v638_v8 = vld [vmem:[%s872_s3] sm:$0xff]   ;;  %s481_s17 = scalar_lea.hbm %s876_s7, %s561_s9 }
  0x16   : > { %574 = vmatprep.subr.bf16.mxu0 %v705_v1  ;;  %588 = vmatprep.mubr.msk.bf16.mxu1 %vm706_vm0, %v705_v1  ;;  %s273_s21 = scalar_lea.vmem %s869_s0, %s547_s18  ;;  %v548_v9 = vld [vmem:[%s871_s2] ss:$0 sm:$0xff]  ;;  %s470_s18 = scalar_lea.sflag [#allocation3], %s267_s20 }
  0x17   : > { %v275_v3 = vld [vmem:[%s273_s21] sm:$0xff]  ;;  %581 = vmatpush3.bf16.msra.mxu1 %v635_v5  ;;  %s546_s21 = sshll.u32 %s267_s20, 3 }
  0x18   : > { %v280_v4 = vpack.c.bf16 %v275_v3, %v275_v3  ;;  %582 = vmatprep.subr.bf16.mxu1 %v705_v1  ;;  %v552_v25 = vld [vmem:[%s873_s4] ss:$0 sm:$0xff]  ;;  %s269_s13 = scalar_lea.vmem [#allocation2], %s546_s21 }
  0x19   : > { %575 = vmatpush3.bf16.msra.mxu0 %v634_v2  ;;  %v558_v42 = vld [vmem:[%s874_s5] ss:$0 sm:$0xff]  ;;  %s483_s14 = sshll.u32 %s269_s13, 4  ;;  %s484_s14 = int_to_ptr.vmem [resolvable:$true] %s483_s14 }
  0x1a   : > { %v559_v44 = vld [vmem:[%s875_s6] ss:$0 sm:$0xff]  ;;  %s643_s19 = scalar_lea.vmem %s484_s14, 128  ;;  %p650_p0 = scmp.lt.s32.totalorder %s484_s14, %s648_s23 }
  0x1b   : > { %583 = vmatpush3.bf16.msra.mxu1 %v636_v6  ;;  %p644_p11 = scmp.ne.s32.totalorder %s484_s14, %s643_s19  ;;  %p651_p1 = scmp.lt.s32.totalorder %s649_s28, %s643_s19 }
  0x1c   : > { %577 = vmatmul.mubr.msk.bf16.vlgmr.msra.gmra.mxu0 %vm300_vm1, %v280_v4  ;;  %584 = vmatprep.subr.bf16.mxu1 %v705_v1 }
  0x1d   : > { %p645_p12 = pnand %p644_p11, %p786_p5  ;;  %p652_p2 = por %p651_p1, %p650_p0 }
  0x1f   : > { %585 = vmatpush3.bf16.msra.mxu1 %v637_v7  ;;  %p646_p13 = pneg %p645_p12 }
  0x20   : > { %586 = vmatprep.subr.bf16.mxu1 %v705_v1 }
  0x21   : > { %p653_p3 = pnand %p652_p2, %p646_p13 }
  0x23   : > { %587 = vmatpush3.bf16.msra.mxu1 %v638_v8 }
  0xdc   : > { %v338_v10 = vpop.f32.mrf.mxu0 }
  0xdd   : > { %v339_v11 = vadd.f32 %v548_v9, %v338_v10 }
  0xde   : > { %v578_v12 = vpop.f32.mrf.mxu0 }
  0xdf   : > { %v345_v13 = vmul.f32 0.044715, %v339_v11  ;;  %v344_v21 = vmul.f32 0.5, %v339_v11 }
  0xe0   : > { %v341_v14 = vpop.f32.mrf.mxu0 }
  0xe1   : > { %v346_v15 = vmul.f32 %v345_v13, %v339_v11 }
  0xe2   : > { %v579_v16 = vpop.f32.mrf.mxu0 }
  0xe3   : > { %v347_v17 = vmul.f32 %v346_v15, %v339_v11 }
  0xe5   : > { %v348_v18 = vadd.f32 %v347_v17, %v339_v11 }
  0xe7   : > { %v349_v19 = vmul.f32 0.7978846, %v348_v18 }
  0xe9   : > { %639 = vtanh.f32 %v349_v19 }
  0xf6   : > { %v640_v20 = vpop.eup %639 }
  0xf7   : > { %v351_v22 = vadd.f32 1.0, %v640_v20 }
  0xf9   : > { %v352_v23 = vmul.f32 %v351_v22, %v344_v21 }
  0xfb   : > { %v353_v24 = vpack.c.bf16 %v352_v23, %v352_v23 }
  0xfd   : > { %589 = vmatmul.mubr.msk.bf16.vlgmr.msra.gmra.mxu1 %vm393_vm2, %v353_v24 }
 0x1bd   : > { %v431_v26 = vpop.f32.mrf.mxu1 }
 0x1be   : > { %v432_v27 = vadd.f32 %v552_v25, %v431_v26 }
 0x1bf   : > { %v590_v28 = vpop.f32.mrf.mxu1 }
 0x1c0   : > { %v437_v29 = vadd.f32 %v432_v27, %v275_v3 }
 0x1c1   : > { %v434_v30 = vpop.f32.mrf.mxu1 }
 0x1c2   : > { %v440_v31 = vsel %vm300_vm1, %v437_v29, 0.0 }
 0x1c3   : > { %441 = vadd.xlane.f32.xlu0 %v440_v31  ;;  %v591_v32 = vpop.f32.mrf.mxu1 }
 0x24c   : > { %v442_v33 = vpop.xlane.xlu0 %441 }
 0x24d   : > { %v444_v34 = vmul.f32 0.03125, %v442_v33 }
 0x24f   : > { %v445_v35 = vsub.f32 %v437_v29, %v444_v34 }
 0x251   : > { %v446_v36 = vmul.f32 %v445_v35, %v445_v35 }
 0x253   : > { %v447_v37 = vsel %vm300_vm1, %v446_v36, 0.0 }
 0x254   : > { %448 = vadd.xlane.f32.xlu0 %v447_v37 }
 0x2dd   : > { %v449_v38 = vpop.xlane.xlu0 %448 }
 0x2de   : > { %v450_v39 = vmul.f32 0.03125, %v449_v38 }
 0x2e0   : > { %v451_v40 = vadd.f32 1e-12, %v450_v39 }
 0x2e2   : > { %641 = vrsqrt.f32 %v451_v40 }
 0x2ef   : > { %v642_v41 = vpop.eup %641 }
 0x2f0   : > { %v453_v43 = vmul.f32 %v642_v41, %v445_v35 }
 0x2f2   : > { %v460_v45 = vmul.f32 %v558_v42, %v453_v43 }
 0x2f4   : > { %v467_v46 = vadd.f32 %v559_v44, %v460_v45 }
 0x2f6   : > { %468 = vst.msk [vmem:[%s269_s13] sm:$0xff] %vm300_vm1, %v467_v46 }
 0x2f7   : > { %656 = shalt.err (!%p653_p3)
}
 0x2f8   : > { %s657_s21 = scalar_lea.hbm %s481_s17, 128  ;;  %s661_s8 = scalar_lea.hbm %s876_s7, 256 }
 0x2f9   : > { %p658_p4 = scmp.ne.s32.totalorder %s481_s17, %s657_s21  ;;  %p662_p9 = scmp.lt.s32.totalorder %s481_s17, %s876_s7 }
 0x2fa   : > { %p663_p10 = scmp.lt.s32.totalorder %s661_s8, %s657_s21 }
 0x2fb   : > { %p659_p7 = pnand %p658_p4, %p786_p5 }
 0x2fc   : > { %p664_p11 = por %p663_p10, %p662_p9 }
 0x2fd   : > { %p660_p8 = pneg %p659_p7 }
 0x2ff   : > { %p665_p12 = pnand %p664_p11, %p660_p8 }
 0x301   : > { %668 = shalt.err (!%p665_p12)
}
 0x302   : > { %592 = dma.vmem_to_hbm [thread:$0]  (%p786_p5), %s484_s14, 128, %s481_s17, %s470_s18  }
 0x303 PF: > { %p598_p13 = scmp.ge.s32.totalorder %s703_s27, 2  ;;  %s495_s15 = sand.u32 1, %s691_s24  }
 0x304   : > { %s496_s16 = scalar_lea.sflag [#allocation3], %s495_s15 }
 0x305   : > { %p595_p0 = pnand %p598_p13, %p790_p6 }
 0x307   : > { %p596_p1 = pneg %p595_p0 }
 0x309   : > { %686 = dma.done.wait (%p596_p1), %s496_s16, 128  }
 0x30a   : > { %688 = vsyncadd (%p596_p1), %s496_s16, 4294967168  ;;  %p17_p2 = scmp.ge.s32.totalorder %s773_s30, 4   ;;  %s879_s24 = smov %s695_s25 }
 0x30b   : > { %s880_s25 = smov %s699_s26  ;;  %s881_s26 = smov %s784_s10 }
 0x30c   : > { %s882_s27 = smov %s773_s30  ;;  %19 = sbr.rel (!%p17_p2) target bundleno = 3 (0x3), region = 83 }
 0x311   :  { %501 = vsyncpa [#allocation3], 1 }
 0x312   :  { %503 = vsyncpa [#allocation3 + $0x1], 1 }

</bundles_post_ra>
